<compile_context>
chip_gen: v5e
topology: v5e:2x2
jax: 0.10.0
libtpu: 0.0.40
codegen_flags: <defaults>
</compile_context>

<pallas_src>
import functools

import jax
import jax.numpy as jnp
from jax import lax
from jax.experimental import pallas as pl
from jax.experimental.pallas import tpu as pltpu


# ----------------------------------------------------------------------------
# Tiling helpers
# ----------------------------------------------------------------------------
def _pick_tile(m, cap, floor):
    """Largest tile <= cap that divides m (power-of-two sweep); full dim if small."""
    if m <= cap:
        return m
    t = cap
    while t >= floor:
        if m % t == 0:
            return t
        t //= 2
    return m


# ----------------------------------------------------------------------------
# Pallas kernels
# ----------------------------------------------------------------------------
def _deconv_taps_kernel(*refs, alpha, fuse_prev_bn):
    """One lane-tile of the ConvTranspose3d "stamp" matmul.

    Transposed layout: the big dim (M = N*Din^3 input voxels) sits in lanes
    (always >= 128, unmasked stores), the small channel dim in sublanes.

      x_ref     : (Cp, tm)        f32  - raw conv output of the previous layer
      w_ref     : (K^3*Cout, Cp)  bf16 - ConvTranspose3d weight, tap/cout major
      scale_ref : (Cp, 1) f32, shift_ref : (Cp, 1) f32
                  previous layer's train-mode BN affine (only if fuse_prev_bn)
      y_ref     : (K^3*Cout, tm)  f32  - per-input-voxel output contributions

    The previous layer's BatchNorm-apply + LeakyReLU is fused here as a
    prologue, so the activated tensor never makes an extra HBM round trip.
    """
    if fuse_prev_bn:
        x_ref, w_ref, scale_ref, shift_ref, y_ref = refs
    else:
        x_ref, w_ref, y_ref = refs

    x = x_ref[...]
    if fuse_prev_bn:
        x = x * scale_ref[...] + shift_ref[...]
        x = jnp.where(x >= 0.0, x, alpha * x)

    y_ref[...] = jnp.dot(w_ref[...], x.astype(jnp.bfloat16),
                         preferred_element_type=jnp.float32)


def _final_act_kernel(*refs, alpha, apply_affine):
    """Final stage on a lane-dense (rows, Do*Do) view: optional trailing
    BN-apply + LeakyReLU (only if the last deconv layer has BatchNorm), then exp."""
    if apply_affine:
        y_ref, scale_ref, shift_ref, o_ref = refs
        y = y_ref[...] * scale_ref[...] + shift_ref[...]
        y = jnp.where(y >= 0.0, y, alpha * y)
    else:
        y_ref, o_ref = refs
        y = y_ref[...]
    o_ref[...] = jnp.exp(y)


# ----------------------------------------------------------------------------
# pallas_call wrappers
# ----------------------------------------------------------------------------
def deconv_taps(x_t, w_t, scale, shift, *, alpha):
    cp, m = x_t.shape
    r = w_t.shape[0]
    tm = _pick_tile(m, cap=2048, floor=128)
    fuse = scale is not None

    kernel = functools.partial(_deconv_taps_kernel, alpha=alpha, fuse_prev_bn=fuse)
    in_specs = [pl.BlockSpec((cp, tm), lambda i: (0, i)),
                pl.BlockSpec((r, cp), lambda i: (0, 0))]
    args = [x_t, w_t]
    if fuse:
        in_specs += [pl.BlockSpec((cp, 1), lambda i: (0, 0)),
                     pl.BlockSpec((cp, 1), lambda i: (0, 0))]
        args += [scale.reshape(cp, 1), shift.reshape(cp, 1)]

    return pl.pallas_call(
        kernel,
        out_shape=jax.ShapeDtypeStruct((r, m), jnp.float32),
        grid_spec=pltpu.PrefetchScalarGridSpec(
            num_scalar_prefetch=0,
            grid=(m // tm,),
            in_specs=in_specs,
            out_specs=pl.BlockSpec((r, tm), lambda i: (0, i))),
        compiler_params=pltpu.CompilerParams(
            dimension_semantics=("parallel",)),   # no cross-step accumulation
    )(*args)


def final_act(y2d, scale_rows, shift_rows, *, alpha):
    rr, ll = y2d.shape
    tr = _pick_tile(rr, cap=1024, floor=8)
    fuse = scale_rows is not None
    kernel = functools.partial(_final_act_kernel, alpha=alpha, apply_affine=fuse)
    in_specs = [pl.BlockSpec((tr, ll), lambda i: (i, 0))]
    args = [y2d]
    if fuse:
        in_specs += [pl.BlockSpec((tr, 1), lambda i: (i, 0)),
                     pl.BlockSpec((tr, 1), lambda i: (i, 0))]
        args += [scale_rows, shift_rows]
    return pl.pallas_call(
        kernel,
        out_shape=jax.ShapeDtypeStruct((rr, ll), jnp.float32),
        grid_spec=pltpu.PrefetchScalarGridSpec(
            num_scalar_prefetch=0,
            grid=(rr // tr,),
            in_specs=in_specs,
            out_specs=pl.BlockSpec((tr, ll), lambda i: (i, 0))),
        compiler_params=pltpu.CompilerParams(
            dimension_semantics=("parallel",)),
    )(*args)


# ----------------------------------------------------------------------------
# Plain-JAX glue: weight packing + col2im scatter (pure data rearrangement)
# ----------------------------------------------------------------------------
def _weight_taps_matrix(w, cp):
    """PyTorch ConvTranspose3d weight (Cin, Cout, K, K, K) ->
    (K^3*Cout, Cp) bf16 matrix for the 'stamp' formulation
    (row index = ((kz*K+ky)*K+kx)*Cout + cout), zero-padded to Cp channels."""
    cin, cout, k = w.shape[0], w.shape[1], w.shape[2]
    wt = jnp.transpose(w, (2, 3, 4, 1, 0)).reshape(k * k * k * cout, cin)
    if cp != cin:
        wt = jnp.pad(wt, ((0, 0), (0, cp - cin)))
    return wt.astype(jnp.bfloat16)


def col2im_stamp(y_taps, stride, padding):
    """Scatter-add of per-input-voxel contributions onto the output grid.

    y_taps : (K, K, K, Cout, N, D, D, D); input voxel j contributes at output
             position i = stride*j - padding + k along each spatial dim.
    Returns (Cout, N, Do, Do, Do), Do = (D-1)*stride - 2*padding + K.
    Implemented with static pads/adds + parity interleave (no scatter HLO).
    """
    k = y_taps.shape[0]
    cout, n, d = y_taps.shape[3], y_taps.shape[4], y_taps.shape[5]
    s = stride
    dc = d + (k - 1) // s                       # coarse (per-parity) extent
    zero = jnp.zeros((cout, n, dc, dc, dc), jnp.float32)
    par = {(a, b, c): zero for a in range(s) for b in range(s) for c in range(s)}
    for kz in range(k):
        sz, rz = kz // s, kz % s
        for ky in range(k):
            sy, ry = ky // s, ky % s
            for kx in range(k):
                sx, rx = kx // s, kx % s
                contrib = jnp.pad(
                    y_taps[kz, ky, kx],
                    ((0, 0), (0, 0),
                     (sz, dc - d - sz), (sy, dc - d - sy), (sx, dc - d - sx)))
                par[(rz, ry, rx)] = par[(rz, ry, rx)] + contrib
    par_arr = jnp.stack(
        [jnp.stack([jnp.stack([par[(a, b, c)] for c in range(s)], axis=0)
                    for b in range(s)], axis=0)
         for a in range(s)], axis=0)            # (s, s, s, Cout, N, dc, dc, dc)
    out = jnp.transpose(par_arr, (3, 4, 5, 0, 6, 1, 7, 2))
    out = out.reshape(cout, n, s * dc, s * dc, s * dc)
    do = (d - 1) * s - 2 * padding + k
    return out[:, :, padding:padding + do,
               padding:padding + do, padding:padding + do]


# ----------------------------------------------------------------------------
# Decoder forward
# ----------------------------------------------------------------------------
def decoder_forward(x_ncdhw, params, cfg):
    k, s, p = cfg["kernel_size"], cfg["stride"], cfg["padding"]
    alpha = cfg["leakyrelu_const"]
    eps = 1e-5

    # channels-major layout (C, N, D, D, D): the big N*D^3 axis stays minor so
    # it maps to TPU lanes inside the kernels, and no transposes are needed
    # between layers.
    y = jnp.transpose(x_ncdhw.astype(jnp.float32), (1, 0, 2, 3, 4))
    pend_scale = pend_shift = None     # pending BN affine of the previous layer

    for layer in params:
        cin, n, d = y.shape[0], y.shape[1], y.shape[2]
        cout = layer["w"].shape[1]
        m = n * d ** 3
        cp = ((cin + 7) // 8) * 8      # pad channel (sublane) dim to mult of 8

        x_t = y.reshape(cin, m)
        if cp != cin:
            x_t = jnp.pad(x_t, ((0, cp - cin), (0, 0)))
        w_t = _weight_taps_matrix(layer["w"], cp)

        if pend_scale is not None:
            sc = jnp.pad(pend_scale, (0, cp - cin)) if cp != cin else pend_scale
            sh = jnp.pad(pend_shift, (0, cp - cin)) if cp != cin else pend_shift
        else:
            sc = sh = None

        # Pallas: (K^3*Cout, M) = W_taps @ LeakyReLU(BN(x))   (prologue fused)
        y_taps = deconv_taps(x_t, w_t, sc, sh, alpha=alpha)
        y_taps = y_taps.reshape(k, k, k, cout, n, d, d, d)
        y = col2im_stamp(y_taps, s, p)                # (Cout, N, Do, Do, Do)

        if layer["bias"] is not None:
            y = y + layer["bias"].reshape(cout, 1, 1, 1, 1)

        if layer["gamma"] is not None:
            # train-mode BatchNorm3d batch statistics (two-pass, biased var);
            # tiny reduction kept in XLA glue -- the affine + LeakyReLU apply
            # is fused into the NEXT Pallas kernel's prologue.
            mean = jnp.mean(y, axis=(1, 2, 3, 4))
            var = jnp.var(y, axis=(1, 2, 3, 4))
            pend_scale = layer["gamma"] * lax.rsqrt(var + eps)
            pend_shift = layer["beta"] - mean * pend_scale
        else:
            pend_scale = pend_shift = None

    # final stage: (optional trailing BN + LeakyReLU) + exp, lane-dense view
    cout, n, do = y.shape[0], y.shape[1], y.shape[2]
    rr, ll = cout * n * do, do * do
    y2d = y.reshape(rr, ll)
    if pend_scale is not None:
        sc_rows = jnp.repeat(pend_scale, n * do).reshape(rr, 1)
        sh_rows = jnp.repeat(pend_shift, n * do).reshape(rr, 1)
    else:
        sc_rows = sh_rows = None
    out = final_act(y2d, sc_rows, sh_rows, alpha=alpha)
    out = out.reshape(cout, n, do, do, do)
    return jnp.transpose(out, (1, 0, 2, 3, 4))        # back to NCDHW


# ----------------------------------------------------------------------------
# Deterministic parameter init (mirrors the module __init__ structure)
# ----------------------------------------------------------------------------
def init_params(key, channels, ch_mult, K, full_limit, just_limit, deconv_bias):
    params = []
    c = channels
    layer = 1
    while layer <= full_limit:
        key, kw, kb, kg, kB = jax.random.split(key, 5)
        co = c // ch_mult
        w = 0.05 * jax.random.normal(kw, (c, co, K, K, K), jnp.float32)
        b = 0.05 * jax.random.normal(kb, (co,), jnp.float32) if deconv_bias else None
        gamma = 1.0 + 0.1 * jax.random.normal(kg, (co,), jnp.float32)
        beta = 0.1 * jax.random.normal(kB, (co,), jnp.float32)
        params.append(dict(w=w, bias=b, gamma=gamma, beta=beta))
        c = co
        layer += 1
    while layer <= just_limit:
        key, kw, kb = jax.random.split(key, 3)
        co = c // ch_mult
        w = 0.05 * jax.random.normal(kw, (c, co, K, K, K), jnp.float32)
        b = 0.05 * jax.random.normal(kb, (co,), jnp.float32) if deconv_bias else None
        params.append(dict(w=w, bias=b, gamma=None, beta=None))
        c = co
        layer += 1
    return params


# ----------------------------------------------------------------------------
# Pure-JAX reference (XLA conv) for correctness checking
# ----------------------------------------------------------------------------
def ref_decoder(x_ncdhw, params, cfg):
    K, s, p = cfg["kernel_size"], cfg["stride"], cfg["padding"]
    alpha = cfg["leakyrelu_const"]
    out = x_ncdhw.astype(jnp.float32)
    for layer in params:
        W = layer["w"]                                       # (Ci, Co, K, K, K)
        Wr = jnp.flip(W, axis=(2, 3, 4)).transpose(1, 0, 2, 3, 4)
        out = lax.conv_general_dilated(
            out, Wr, window_strides=(1, 1, 1),
            padding=[(K - 1 - p, K - 1 - p)] * 3,
            lhs_dilation=(s, s, s),
            dimension_numbers=("NCDHW", "OIDHW", "NCDHW"))
        if layer["bias"] is not None:
            out = out + layer["bias"].reshape(1, -1, 1, 1, 1)
        if layer["gamma"] is not None:
            mean = out.mean(axis=(0, 2, 3, 4), keepdims=True)
            var = ((out - mean) ** 2).mean(axis=(0, 2, 3, 4), keepdims=True)
            out = (layer["gamma"].reshape(1, -1, 1, 1, 1) * (out - mean)
                   / jnp.sqrt(var + 1e-5) + layer["beta"].reshape(1, -1, 1, 1, 1))
            out = jnp.where(out >= 0, out, alpha * out)
    return jnp.exp(out)


# ----------------------------------------------------------------------------
if __name__ == "__main__":
    cfg = dict(kernel_size=4, stride=2, padding=1,
               ch_mult=2, deconv_bias=False, leakyrelu_const=0.2,
               full_deconv_limit=2, just_deconv_limit=3)
    encoder_channels = 8     # D_encoder.channels
    embed_cube_edge = 4      # D_encoder.embed_cube_edge
    batch = 2

    key = jax.random.PRNGKey(0)
    key, kx = jax.random.split(key)
    params = init_params(key, encoder_channels, cfg["ch_mult"], cfg["kernel_size"],
                         cfg["full_deconv_limit"], cfg["just_deconv_limit"],
                         cfg["deconv_bias"])
    x = jax.random.normal(kx, (batch, encoder_channels,
                               embed_cube_edge, embed_cube_edge, embed_cube_edge),
                          jnp.float32)

    fwd = jax.jit(functools.partial(decoder_forward, cfg=cfg))
    out = fwd(x, params)
    out = jax.block_until_ready(out)

    assert out.shape == (batch, 1, 32, 32, 32), out.shape

    ref = ref_decoder(x, params, cfg)
    err = float(jnp.max(jnp.abs(out - ref)))
    if not bool(jnp.allclose(out, ref, atol=5e-2, rtol=5e-2)):
        raise AssertionError(f"mismatch: max abs err {err}")

    print("KERNEL_OK")
</pallas_src>

<mosaic_0001>
module attributes {stable_mosaic.version = 11 : i64} {
  func.func @_deconv_taps_kernel(%arg0: i32, %arg1: memref<8x128xf32, #tpu.memory_space<vmem>>, %arg2: memref<256x8xbf16, #tpu.memory_space<vmem>>, %arg3: memref<256x128xf32, #tpu.memory_space<vmem>>) attributes {dimension_semantics = [#tpu.dimension_semantics<parallel>], iteration_bounds = array<i64: 1>, scalar_prefetch = 0 : i64, scratch_operands = 0 : i64, tpu.core_type = #tpu.core_type<tc>, window_params = [{transform_indices = @transform_0, window_bounds = array<i64: 8, 128>}, {pipeline_mode = #tpu.pipeline_mode<synchronous>, transform_indices = @transform_1, window_bounds = array<i64: 256, 8>}, {transform_indices = @transform_2, window_bounds = array<i64: 256, 128>}]} {
    %c0 = arith.constant 0 : index
    %c0_0 = arith.constant 0 : index
    %0 = vector.load %arg1[%c0, %c0_0] : memref<8x128xf32, #tpu.memory_space<vmem>>, vector<8x128xf32>
    %c0_1 = arith.constant 0 : index
    %c0_2 = arith.constant 0 : index
    %1 = vector.load %arg2[%c0_1, %c0_2] : memref<256x8xbf16, #tpu.memory_space<vmem>>, vector<256x8xbf16>
    %2 = arith.truncf %0 : vector<8x128xf32> to vector<8x128xbf16>
    %cst = arith.constant dense<0.000000e+00> : vector<256x128xf32>
    %3 = tpu.matmul %1, %2, %cst {dimension_numbers = #tpu.dot_dimension_numbers<[1], [0], [0], [1], [0, 0, 1, 1], [], []>} : vector<256x8xbf16>, vector<8x128xbf16>, vector<256x128xf32> -> vector<256x128xf32>
    %c0_3 = arith.constant 0 : index
    %c0_4 = arith.constant 0 : index
    %4 = vector.load %arg3[%c0_3, %c0_4] : memref<256x128xf32, #tpu.memory_space<vmem>>, vector<256x128xf32>
    tpu.vector_store %arg3[%c0_3, %c0_4], %3 {strides = array<i32>} : memref<256x128xf32, #tpu.memory_space<vmem>>, vector<256x128xf32>,
    return
  }
  func.func @transform_0(%arg0: i32) -> (i32, i32) {
    %c0_i32 = arith.constant 0 : i32
    %c0_i32_0 = arith.constant 0 : i32
    return %c0_i32, %arg0 : i32, i32
  }
  func.func @transform_1(%arg0: i32) -> (i32, i32) {
    %c0_i32 = arith.constant 0 : i32
    %c0_i32_0 = arith.constant 0 : i32
    %c0_i32_1 = arith.constant 0 : i32
    return %c0_i32, %c0_i32_0 : i32, i32
  }
  func.func @transform_2(%arg0: i32) -> (i32, i32) {
    %c0_i32 = arith.constant 0 : i32
    %c0_i32_0 = arith.constant 0 : i32
    return %c0_i32, %arg0 : i32, i32
  }
}

module attributes {stable_mosaic.version = 11 : i64} {
  func.func @_deconv_taps_kernel(%arg0: i32, %arg1: memref<8x1024xf32, #tpu.memory_space<vmem>>, %arg2: memref<128x8xbf16, #tpu.memory_space<vmem>>, %arg3: memref<8x1xf32, #tpu.memory_space<vmem>>, %arg4: memref<8x1xf32, #tpu.memory_space<vmem>>, %arg5: memref<128x1024xf32, #tpu.memory_space<vmem>>) attributes {dimension_semantics = [#tpu.dimension_semantics<parallel>], iteration_bounds = array<i64: 1>, scalar_prefetch = 0 : i64, scratch_operands = 0 : i64, tpu.core_type = #tpu.core_type<tc>, window_params = [{transform_indices = @transform_0, window_bounds = array<i64: 8, 1024>}, {pipeline_mode = #tpu.pipeline_mode<synchronous>, transform_indices = @transform_1, window_bounds = array<i64: 128, 8>}, {pipeline_mode = #tpu.pipeline_mode<synchronous>, transform_indices = @transform_2, window_bounds = array<i64: 8, 1>}, {pipeline_mode = #tpu.pipeline_mode<synchronous>, transform_indices = @transform_3, window_bounds = array<i64: 8, 1>}, {transform_indices = @transform_4, window_bounds = array<i64: 128, 1024>}]} {
    %c0 = arith.constant 0 : index
    %c0_0 = arith.constant 0 : index
    %0 = vector.load %arg1[%c0, %c0_0] : memref<8x1024xf32, #tpu.memory_space<vmem>>, vector<8x1024xf32>
    %c0_1 = arith.constant 0 : index
    %c0_2 = arith.constant 0 : index
    %1 = vector.load %arg3[%c0_1, %c0_2] : memref<8x1xf32, #tpu.memory_space<vmem>>, vector<8x1xf32>
    %2 = vector.broadcast %1 : vector<8x1xf32> to vector<8x1024xf32>
    %3 = arith.mulf %0, %2 : vector<8x1024xf32>
    %c0_3 = arith.constant 0 : index
    %c0_4 = arith.constant 0 : index
    %4 = vector.load %arg4[%c0_3, %c0_4] : memref<8x1xf32, #tpu.memory_space<vmem>>, vector<8x1xf32>
    %5 = vector.broadcast %4 : vector<8x1xf32> to vector<8x1024xf32>
    %6 = arith.addf %3, %5 : vector<8x1024xf32>
    %cst = arith.constant 0.000000e+00 : f32
    %7 = vector.broadcast %cst : f32 to vector<8x1024xf32>
    %8 = arith.cmpf oge, %6, %7 : vector<8x1024xf32>
    %cst_5 = arith.constant 2.000000e-01 : f32
    %9 = vector.broadcast %cst_5 : f32 to vector<8x1024xf32>
    %10 = arith.mulf %9, %6 : vector<8x1024xf32>
    %11 = arith.select %8, %6, %10 : vector<8x1024xi1>, vector<8x1024xf32>
    %c0_6 = arith.constant 0 : index
    %c0_7 = arith.constant 0 : index
    %12 = vector.load %arg2[%c0_6, %c0_7] : memref<128x8xbf16, #tpu.memory_space<vmem>>, vector<128x8xbf16>
    %13 = arith.truncf %11 : vector<8x1024xf32> to vector<8x1024xbf16>
    %cst_8 = arith.constant dense<0.000000e+00> : vector<128x1024xf32>
    %14 = tpu.matmul %12, %13, %cst_8 {dimension_numbers = #tpu.dot_dimension_numbers<[1], [0], [0], [1], [0, 0, 1, 1], [], []>} : vector<128x8xbf16>, vector<8x1024xbf16>, vector<128x1024xf32> -> vector<128x1024xf32>
    %c0_9 = arith.constant 0 : index
    %c0_10 = arith.constant 0 : index
    %15 = vector.load %arg5[%c0_9, %c0_10] : memref<128x1024xf32, #tpu.memory_space<vmem>>, vector<128x1024xf32>
    tpu.vector_store %arg5[%c0_9, %c0_10], %14 {strides = array<i32>} : memref<128x1024xf32, #tpu.memory_space<vmem>>, vector<128x1024xf32>,
    return
  }
  func.func @transform_0(%arg0: i32) -> (i32, i32) {
    %c0_i32 = arith.constant 0 : i32
    %c0_i32_0 = arith.constant 0 : i32
    return %c0_i32, %arg0 : i32, i32
  }
  func.func @transform_1(%arg0: i32) -> (i32, i32) {
    %c0_i32 = arith.constant 0 : i32
    %c0_i32_0 = arith.constant 0 : i32
    %c0_i32_1 = arith.constant 0 : i32
    return %c0_i32, %c0_i32_0 : i32, i32
  }
  func.func @transform_2(%arg0: i32) -> (i32, i32) {
    %c0_i32 = arith.constant 0 : i32
    %c0_i32_0 = arith.constant 0 : i32
    %c0_i32_1 = arith.constant 0 : i32
    return %c0_i32, %c0_i32_0 : i32, i32
  }
  func.func @transform_3(%arg0: i32) -> (i32, i32) {
    %c0_i32 = arith.constant 0 : i32
    %c0_i32_0 = arith.constant 0 : i32
    %c0_i32_1 = arith.constant 0 : i32
    return %c0_i32, %c0_i32_0 : i32, i32
  }
  func.func @transform_4(%arg0: i32) -> (i32, i32) {
    %c0_i32 = arith.constant 0 : i32
    %c0_i32_0 = arith.constant 0 : i32
    return %c0_i32, %arg0 : i32, i32
  }
}

module attributes {stable_mosaic.version = 11 : i64} {
  func.func @_deconv_taps_kernel(%arg0: i32, %arg1: memref<8x2048xf32, #tpu.memory_space<vmem>>, %arg2: memref<64x8xbf16, #tpu.memory_space<vmem>>, %arg3: memref<8x1xf32, #tpu.memory_space<vmem>>, %arg4: memref<8x1xf32, #tpu.memory_space<vmem>>, %arg5: memref<64x2048xf32, #tpu.memory_space<vmem>>) attributes {dimension_semantics = [#tpu.dimension_semantics<parallel>], iteration_bounds = array<i64: 4>, scalar_prefetch = 0 : i64, scratch_operands = 0 : i64, tpu.core_type = #tpu.core_type<tc>, window_params = [{transform_indices = @transform_0, window_bounds = array<i64: 8, 2048>}, {pipeline_mode = #tpu.pipeline_mode<synchronous>, transform_indices = @transform_1, window_bounds = array<i64: 64, 8>}, {pipeline_mode = #tpu.pipeline_mode<synchronous>, transform_indices = @transform_2, window_bounds = array<i64: 8, 1>}, {pipeline_mode = #tpu.pipeline_mode<synchronous>, transform_indices = @transform_3, window_bounds = array<i64: 8, 1>}, {transform_indices = @transform_4, window_bounds = array<i64: 64, 2048>}]} {
    %c0 = arith.constant 0 : index
    %c0_0 = arith.constant 0 : index
    %0 = vector.load %arg1[%c0, %c0_0] : memref<8x2048xf32, #tpu.memory_space<vmem>>, vector<8x2048xf32>
    %c0_1 = arith.constant 0 : index
    %c0_2 = arith.constant 0 : index
    %1 = vector.load %arg3[%c0_1, %c0_2] : memref<8x1xf32, #tpu.memory_space<vmem>>, vector<8x1xf32>
    %2 = vector.broadcast %1 : vector<8x1xf32> to vector<8x2048xf32>
    %3 = arith.mulf %0, %2 : vector<8x2048xf32>
    %c0_3 = arith.constant 0 : index
    %c0_4 = arith.constant 0 : index
    %4 = vector.load %arg4[%c0_3, %c0_4] : memref<8x1xf32, #tpu.memory_space<vmem>>, vector<8x1xf32>
    %5 = vector.broadcast %4 : vector<8x1xf32> to vector<8x2048xf32>
    %6 = arith.addf %3, %5 : vector<8x2048xf32>
    %cst = arith.constant 0.000000e+00 : f32
    %7 = vector.broadcast %cst : f32 to vector<8x2048xf32>
    %8 = arith.cmpf oge, %6, %7 : vector<8x2048xf32>
    %cst_5 = arith.constant 2.000000e-01 : f32
    %9 = vector.broadcast %cst_5 : f32 to vector<8x2048xf32>
    %10 = arith.mulf %9, %6 : vector<8x2048xf32>
    %11 = arith.select %8, %6, %10 : vector<8x2048xi1>, vector<8x2048xf32>
    %c0_6 = arith.constant 0 : index
    %c0_7 = arith.constant 0 : index
    %12 = vector.load %arg2[%c0_6, %c0_7] : memref<64x8xbf16, #tpu.memory_space<vmem>>, vector<64x8xbf16>
    %13 = arith.truncf %11 : vector<8x2048xf32> to vector<8x2048xbf16>
    %cst_8 = arith.constant dense<0.000000e+00> : vector<64x2048xf32>
    %14 = tpu.matmul %12, %13, %cst_8 {dimension_numbers = #tpu.dot_dimension_numbers<[1], [0], [0], [1], [0, 0, 1, 1], [], []>} : vector<64x8xbf16>, vector<8x2048xbf16>, vector<64x2048xf32> -> vector<64x2048xf32>
    %c0_9 = arith.constant 0 : index
    %c0_10 = arith.constant 0 : index
    %15 = vector.load %arg5[%c0_9, %c0_10] : memref<64x2048xf32, #tpu.memory_space<vmem>>, vector<64x2048xf32>
    tpu.vector_store %arg5[%c0_9, %c0_10], %14 {strides = array<i32>} : memref<64x2048xf32, #tpu.memory_space<vmem>>, vector<64x2048xf32>,
    return
  }
  func.func @transform_0(%arg0: i32) -> (i32, i32) {
    %c0_i32 = arith.constant 0 : i32
    %c0_i32_0 = arith.constant 0 : i32
    return %c0_i32, %arg0 : i32, i32
  }
  func.func @transform_1(%arg0: i32) -> (i32, i32) {
    %c0_i32 = arith.constant 0 : i32
    %c0_i32_0 = arith.constant 0 : i32
    %c0_i32_1 = arith.constant 0 : i32
    return %c0_i32, %c0_i32_0 : i32, i32
  }
  func.func @transform_2(%arg0: i32) -> (i32, i32) {
    %c0_i32 = arith.constant 0 : i32
    %c0_i32_0 = arith.constant 0 : i32
    %c0_i32_1 = arith.constant 0 : i32
    return %c0_i32, %c0_i32_0 : i32, i32
  }
  func.func @transform_3(%arg0: i32) -> (i32, i32) {
    %c0_i32 = arith.constant 0 : i32
    %c0_i32_0 = arith.constant 0 : i32
    %c0_i32_1 = arith.constant 0 : i32
    return %c0_i32, %c0_i32_0 : i32, i32
  }
  func.func @transform_4(%arg0: i32) -> (i32, i32) {
    %c0_i32 = arith.constant 0 : i32
    %c0_i32_0 = arith.constant 0 : i32
    return %c0_i32, %arg0 : i32, i32
  }
}

module attributes {stable_mosaic.version = 11 : i64} {
  func.func @_final_act_kernel(%arg0: i32, %arg1: memref<64x1024xf32, #tpu.memory_space<vmem>>, %arg2: memref<64x1024xf32, #tpu.memory_space<vmem>>) attributes {dimension_semantics = [#tpu.dimension_semantics<parallel>], iteration_bounds = array<i64: 1>, scalar_prefetch = 0 : i64, scratch_operands = 0 : i64, tpu.core_type = #tpu.core_type<tc>, window_params = [{transform_indices = @transform_0, window_bounds = array<i64: 64, 1024>}, {transform_indices = @transform_1, window_bounds = array<i64: 64, 1024>}]} {
    %c0 = arith.constant 0 : index
    %c0_0 = arith.constant 0 : index
    %0 = vector.load %arg1[%c0, %c0_0] : memref<64x1024xf32, #tpu.memory_space<vmem>>, vector<64x1024xf32>
    %1 = math.exp %0 : vector<64x1024xf32>
    %c0_1 = arith.constant 0 : index
    %c0_2 = arith.constant 0 : index
    %2 = vector.load %arg2[%c0_1, %c0_2] : memref<64x1024xf32, #tpu.memory_space<vmem>>, vector<64x1024xf32>
    tpu.vector_store %arg2[%c0_1, %c0_2], %1 {strides = array<i32>} : memref<64x1024xf32, #tpu.memory_space<vmem>>, vector<64x1024xf32>,
    return
  }
  func.func @transform_0(%arg0: i32) -> (i32, i32) {
    %c0_i32 = arith.constant 0 : i32
    %c0_i32_0 = arith.constant 0 : i32
    return %arg0, %c0_i32 : i32, i32
  }
  func.func @transform_1(%arg0: i32) -> (i32, i32) {
    %c0_i32 = arith.constant 0 : i32
    %c0_i32_0 = arith.constant 0 : i32
    return %arg0, %c0_i32 : i32, i32
  }
}

</mosaic_0001>

<bundles_post_ra>
// kernel: decoder_forward.4
= control target key start
LH: loop header
LB: loop body
LE: loop exit
PB: predicated region body
PF: predicated region fallthrough
CT: control target
= control target key end

     0   :  { %vm175_vm0 = vcmask 1043456   ;;  %vm126_vm1 = vcmask 64512   ;;  %s581_s0 = inlined_call_operand.vmem [shape: f32[8,128], index: 0, kind: input, shape index: {}]   ;;  %s582_s1 = inlined_call_operand.vmem [shape: bf16[256,8], index: 1, kind: input, shape index: {}]   ;;  %s583_s2 = inlined_call_operand.vmem [shape: f32[256,128], index: 2, kind: output, shape index: {}]  }
   0x1   :  { %v12_v0 = vld [vmem:[%s581_s0] sm:$0xff]  ;;  %v385_v7 = vld [vmem:[%s582_s1 + $0x8] sm:$0xff]  ;;  %v386_v11 = vld [vmem:[%s582_s1 + $0x10] sm:$0xff] }
   0x2   :  { %v45_v1 = vpack.c.bf16 %v12_v0, %v12_v0  ;;  %v384_v3 = vld [vmem:[%s582_s1] sm:$0xff]  ;;  %v389_v8 = vld [vmem:[%s582_s1 + $0x28] sm:$0xff]  ;;  %v390_v12 = vld [vmem:[%s582_s1 + $0x30] sm:$0xff] }
   0x3   :  { %v388_v4 = vld [vmem:[%s582_s1 + $0x20] sm:$0xff]  ;;  %v393_v9 = vld [vmem:[%s582_s1 + $0x48] sm:$0xff]  ;;  %v394_v13 = vld [vmem:[%s582_s1 + $0x50] sm:$0xff] }
   0x4   :  { %v177_v2 = vsel %vm175_vm0, %v45_v1, 0  ;;  %v392_v5 = vld [vmem:[%s582_s1 + $0x40] sm:$0xff]  ;;  %v397_v10 = vld [vmem:[%s582_s1 + $0x68] sm:$0xff]  ;;  %v398_v14 = vld [vmem:[%s582_s1 + $0x70] sm:$0xff] }
   0x5   :  { %186 = vmatpush.bf16.msra.mxu0 %v177_v2  ;;  %400 = vmatpush.bf16.msra.mxu1 %v177_v2  ;;  %v396_v6 = vld [vmem:[%s582_s1 + $0x60] sm:$0xff]  ;;  %v387_v15 = vld [vmem:[%s582_s1 + $0x18] sm:$0xff] }
   0x6   :  { %401 = vmatpush.bf16.msra.mxu2 %v177_v2  ;;  %402 = vmatpush.bf16.msra.mxu3 %v177_v2  ;;  %v391_v16 = vld [vmem:[%s582_s1 + $0x38] sm:$0xff] }
   0x7   :  { %v395_v17 = vld [vmem:[%s582_s1 + $0x58] sm:$0xff] }
   0x8   :  { %368 = vmatmul.msk.bf16.vlgmr.msra.gmra.mxu0 %vm126_vm1, %v384_v3  ;;  %372 = vmatmul.msk.bf16.vlgmr.msra.gmra.mxu1 %vm126_vm1, %v388_v4  ;;  %v399_v18 = vld [vmem:[%s582_s1 + $0x78] sm:$0xff] }
   0x9   :  { %376 = vmatmul.msk.bf16.vlgmr.msra.gmra.mxu2 %vm126_vm1, %v392_v5  ;;  %380 = vmatmul.msk.bf16.vlgmr.msra.gmra.mxu3 %vm126_vm1, %v396_v6 }
  0x18   :  { %369 = vmatmul.msk.bf16.gmra.mxu0 %vm126_vm1, %v385_v7  ;;  %373 = vmatmul.msk.bf16.gmra.mxu1 %vm126_vm1, %v389_v8 }
  0x19   :  { %377 = vmatmul.msk.bf16.gmra.mxu2 %vm126_vm1, %v393_v9  ;;  %381 = vmatmul.msk.bf16.gmra.mxu3 %vm126_vm1, %v397_v10 }
  0x28   :  { %370 = vmatmul.msk.bf16.gmra.mxu0 %vm126_vm1, %v386_v11  ;;  %374 = vmatmul.msk.bf16.gmra.mxu1 %vm126_vm1, %v390_v12 }
  0x29   :  { %378 = vmatmul.msk.bf16.gmra.mxu2 %vm126_vm1, %v394_v13  ;;  %382 = vmatmul.msk.bf16.gmra.mxu3 %vm126_vm1, %v398_v14 }
  0x38   :  { %371 = vmatmul.msk.bf16.gmra.mxu0 %vm126_vm1, %v387_v15  ;;  %375 = vmatmul.msk.bf16.gmra.mxu1 %vm126_vm1, %v391_v16 }
  0x39   :  { %379 = vmatmul.msk.bf16.gmra.mxu2 %vm126_vm1, %v395_v17  ;;  %383 = vmatmul.msk.bf16.gmra.mxu3 %vm126_vm1, %v399_v18 }
  0x85   :  { %v188_v19 = vpop.f32.mrf.mxu0  ;;  %v208_v20 = vpop.f32.mrf.mxu1 }
  0x86   :  { %268 = vst [vmem:[%s583_s2] sm:$0xff] %v188_v19 }
  0x87   :  { %276 = vst [vmem:[%s583_s2 + $0x40] sm:$0xff] %v208_v20 }
  0x8c   :  { %v228_v21 = vpop.f32.mrf.mxu2  ;;  %v248_v22 = vpop.f32.mrf.mxu3 }
  0x8d   :  { %284 = vst [vmem:[%s583_s2 + $0x80] sm:$0xff] %v228_v21  ;;  %v190_v23 = vpop.f32.mrf.mxu0  ;;  %v210_v24 = vpop.f32.mrf.mxu1 }
  0x8e   :  { %292 = vst [vmem:[%s583_s2 + $0xc0] sm:$0xff] %v248_v22 }
  0x8f   :  { %269 = vst [vmem:[%s583_s2 + $0x8] sm:$0xff] %v190_v23 }
  0x90   :  { %277 = vst [vmem:[%s583_s2 + $0x48] sm:$0xff] %v210_v24 }
  0x94   :  { %v230_v25 = vpop.f32.mrf.mxu2  ;;  %v250_v26 = vpop.f32.mrf.mxu3 }
  0x95   :  { %285 = vst [vmem:[%s583_s2 + $0x88] sm:$0xff] %v230_v25  ;;  %v193_v27 = vpop.f32.mrf.mxu0  ;;  %v213_v28 = vpop.f32.mrf.mxu1 }
  0x96   :  { %293 = vst [vmem:[%s583_s2 + $0xc8] sm:$0xff] %v250_v26 }
  0x97   :  { %270 = vst [vmem:[%s583_s2 + $0x10] sm:$0xff] %v193_v27 }
  0x98   :  { %278 = vst [vmem:[%s583_s2 + $0x50] sm:$0xff] %v213_v28 }
  0x9c   :  { %v233_v29 = vpop.f32.mrf.mxu2  ;;  %v253_v30 = vpop.f32.mrf.mxu3 }
  0x9d   :  { %286 = vst [vmem:[%s583_s2 + $0x90] sm:$0xff] %v233_v29  ;;  %v195_v31 = vpop.f32.mrf.mxu0  ;;  %v215_v32 = vpop.f32.mrf.mxu1 }
  0x9e   :  { %294 = vst [vmem:[%s583_s2 + $0xd0] sm:$0xff] %v253_v30 }
  0x9f   :  { %271 = vst [vmem:[%s583_s2 + $0x18] sm:$0xff] %v195_v31 }
  0xa0   :  { %279 = vst [vmem:[%s583_s2 + $0x58] sm:$0xff] %v215_v32 }
  0xa4   :  { %v235_v33 = vpop.f32.mrf.mxu2  ;;  %v255_v34 = vpop.f32.mrf.mxu3 }
  0xa5   :  { %287 = vst [vmem:[%s583_s2 + $0x98] sm:$0xff] %v235_v33  ;;  %v198_v35 = vpop.f32.mrf.mxu0  ;;  %v218_v36 = vpop.f32.mrf.mxu1 }
  0xa6   :  { %295 = vst [vmem:[%s583_s2 + $0xd8] sm:$0xff] %v255_v34 }
  0xa7   :  { %272 = vst [vmem:[%s583_s2 + $0x20] sm:$0xff] %v198_v35 }
  0xa8   :  { %280 = vst [vmem:[%s583_s2 + $0x60] sm:$0xff] %v218_v36 }
  0xac   :  { %v238_v37 = vpop.f32.mrf.mxu2  ;;  %v258_v38 = vpop.f32.mrf.mxu3 }
  0xad   :  { %288 = vst [vmem:[%s583_s2 + $0xa0] sm:$0xff] %v238_v37  ;;  %v200_v39 = vpop.f32.mrf.mxu0  ;;  %v220_v40 = vpop.f32.mrf.mxu1 }
  0xae   :  { %296 = vst [vmem:[%s583_s2 + $0xe0] sm:$0xff] %v258_v38 }
  0xaf   :  { %273 = vst [vmem:[%s583_s2 + $0x28] sm:$0xff] %v200_v39 }
  0xb0   :  { %281 = vst [vmem:[%s583_s2 + $0x68] sm:$0xff] %v220_v40 }
  0xb4   :  { %v240_v41 = vpop.f32.mrf.mxu2  ;;  %v260_v42 = vpop.f32.mrf.mxu3 }
  0xb5   :  { %289 = vst [vmem:[%s583_s2 + $0xa8] sm:$0xff] %v240_v41  ;;  %v203_v43 = vpop.f32.mrf.mxu0  ;;  %v223_v44 = vpop.f32.mrf.mxu1 }
  0xb6   :  { %297 = vst [vmem:[%s583_s2 + $0xe8] sm:$0xff] %v260_v42 }
  0xb7   :  { %274 = vst [vmem:[%s583_s2 + $0x30] sm:$0xff] %v203_v43 }
  0xb8   :  { %282 = vst [vmem:[%s583_s2 + $0x70] sm:$0xff] %v223_v44 }
  0xbc   :  { %v243_v45 = vpop.f32.mrf.mxu2  ;;  %v263_v46 = vpop.f32.mrf.mxu3 }
  0xbd   :  { %290 = vst [vmem:[%s583_s2 + $0xb0] sm:$0xff] %v243_v45  ;;  %v205_v47 = vpop.f32.mrf.mxu0  ;;  %v225_v48 = vpop.f32.mrf.mxu1 }
  0xbe   :  { %298 = vst [vmem:[%s583_s2 + $0xf0] sm:$0xff] %v263_v46 }
  0xbf   :  { %275 = vst [vmem:[%s583_s2 + $0x38] sm:$0xff] %v205_v47 }
  0xc0   :  { %283 = vst [vmem:[%s583_s2 + $0x78] sm:$0xff] %v225_v48 }
  0xc4   :  { %v245_v49 = vpop.f32.mrf.mxu2  ;;  %v265_v50 = vpop.f32.mrf.mxu3 }
  0xc5   :  { %291 = vst [vmem:[%s583_s2 + $0xb8] sm:$0xff] %v245_v49 }
  0xc6   :  { %299 = vst [vmem:[%s583_s2 + $0xf8] sm:$0xff] %v265_v50 }

// kernel: decoder_forward.5
= control target key start
LH: loop header
LB: loop body
LE: loop exit
PB: predicated region body
PF: predicated region fallthrough
CT: control target
= control target key end

     0   :  { %v822_v0 = vmov 0   ;;  %vm167_vm0 = vcmask 1043456   ;;  %vm142_vm1 = vcmask 64512   ;;  %s1438_s2 = inlined_call_operand.vmem [shape: f32[8,1], index: 2, kind: input, shape index: {}]   ;;  %s1439_s3 = inlined_call_operand.vmem [shape: f32[8,1], index: 3, kind: input, shape index: {}]   ;;  %s1440_s0 = inlined_call_operand.vmem [shape: f32[8,1024], index: 0, kind: input, shape index: {}]   ;;  %s1441_s1 = inlined_call_operand.vmem [shape: bf16[128,8], index: 1, kind: input, shape index: {}]   ;;  %s1442_s4 = inlined_call_operand.vmem [shape: f32[128,1024], index: 4, kind: output, shape index: {}]  }
   0x1   :  { %821 = vset.pattern.permute.xlu0 %v822_v0  ;;  %v26_v1 = vld [vmem:[%s1438_s2] sm:$0xff]  ;;  %v19_v5 = vld [vmem:[%s1440_s0 + $0x8] sm:$0xff]  ;;  %v20_v6 = vld [vmem:[%s1440_s0 + $0x10] sm:$0xff] }
   0x2   :  { %29 = vperm.xlu0 %821, %v26_v1   ;;  %v40_v2 = vld [vmem:[%s1439_s3] sm:$0xff]  ;;  %v21_v7 = vld [vmem:[%s1440_s0 + $0x18] sm:$0xff]  ;;  %v23_v9 = vld [vmem:[%s1440_s0 + $0x28] sm:$0xff] }
   0x3   :  { %v18_v4 = vld [vmem:[%s1440_s0] sm:$0xff]  ;;  %v24_v10 = vld [vmem:[%s1440_s0 + $0x30] sm:$0xff]  ;;  %v25_v11 = vld [vmem:[%s1440_s0 + $0x38] sm:$0xff] }
   0x4   :  { %v22_v8 = vld [vmem:[%s1440_s0 + $0x20] sm:$0xff]  ;;  %v902_v62 = vld [vmem:[%s1441_s1 + $0x8] sm:$0xff]  ;;  %v915_v63 = vld [vmem:[%s1441_s1 + $0x10] sm:$0xff] }
   0x5   :  { %v883_v47 = vld [vmem:[%s1441_s1] sm:$0xff]  ;;  %v928_v0 = vld [vmem:[%s1441_s1 + $0x18] sm:$0xff] }
   0x6   :  { %v941_v1 = vld [vmem:[%s1441_s1 + $0x20] sm:$0xff] }
   0xa   :  { %43 = vperm.xlu0 %821, %v40_v2   ;;  %v954_v2 = vld [vmem:[%s1441_s1 + $0x28] sm:$0xff] }
  0x74   :  { %v30_v3 = vpop.permute.xlu0 %29 }
  0x75   :  { %v32_v12 = vmul.f32 %v30_v3, %v18_v4  ;;  %v33_v13 = vmul.f32 %v30_v3, %v19_v5  ;;  %v34_v14 = vmul.f32 %v30_v3, %v20_v6  ;;  %v35_v15 = vmul.f32 %v30_v3, %v21_v7  ;;  %v980_v4 = vld [vmem:[%s1441_s1 + $0x38] sm:$0xff] }
  0x76   :  { %v36_v17 = vmul.f32 %v30_v3, %v22_v8  ;;  %v37_v18 = vmul.f32 %v30_v3, %v23_v9  ;;  %v38_v19 = vmul.f32 %v30_v3, %v24_v10  ;;  %v39_v20 = vmul.f32 %v30_v3, %v25_v11  ;;  %v967_v3 = vld [vmem:[%s1441_s1 + $0x30] sm:$0xff] }
  0x7c   :  { %v44_v16 = vpop.permute.xlu0 %43 }
  0x7d   :  { %v46_v21 = vadd.f32 %v44_v16, %v32_v12  ;;  %v47_v22 = vadd.f32 %v44_v16, %v33_v13  ;;  %v48_v23 = vadd.f32 %v44_v16, %v34_v14  ;;  %v49_v24 = vadd.f32 %v44_v16, %v35_v15 }
  0x7e   :  { %v50_v25 = vadd.f32 %v44_v16, %v36_v17  ;;  %v51_v26 = vadd.f32 %v44_v16, %v37_v18  ;;  %v52_v27 = vadd.f32 %v44_v16, %v38_v19  ;;  %v53_v28 = vadd.f32 %v44_v16, %v39_v20 }
  0x7f   :  { %vm54_vm2 = vcmp.ge.f32.partialorder %v46_v21, 0.0  ;;  %v62_v29 = vmul.f32 0.2, %v46_v21  ;;  %vm55_vm3 = vcmp.ge.f32.partialorder %v47_v22, 0.0  ;;  %v63_v30 = vmul.f32 0.2, %v47_v22 }
  0x80   :  { %vm56_vm4 = vcmp.ge.f32.partialorder %v48_v23, 0.0  ;;  %v64_v31 = vmul.f32 0.2, %v48_v23  ;;  %vm57_vm5 = vcmp.ge.f32.partialorder %v49_v24, 0.0  ;;  %v65_v32 = vmul.f32 0.2, %v49_v24 }
  0x81   :  { %v70_v33 = vsel %vm54_vm2, %v46_v21, %v62_v29  ;;  %v71_v34 = vsel %vm55_vm3, %v47_v22, %v63_v30  ;;  %vm58_vm6 = vcmp.ge.f32.partialorder %v50_v25, 0.0  ;;  %v66_v35 = vmul.f32 0.2, %v50_v25 }
  0x82   :  { %v94_v36 = vpack.c.bf16 %v70_v33, %v70_v33  ;;  %v95_v37 = vpack.c.bf16 %v71_v34, %v71_v34  ;;  %v72_v38 = vsel %vm56_vm4, %v48_v23, %v64_v31  ;;  %v73_v39 = vsel %vm57_vm5, %v49_v24, %v65_v32 }
  0x83   :  { %v96_v40 = vpack.c.bf16 %v72_v38, %v72_v38  ;;  %v97_v41 = vpack.c.bf16 %v73_v39, %v73_v39  ;;  %v74_v42 = vsel %vm58_vm6, %v50_v25, %v66_v35  ;;  %vm59_vm7 = vcmp.ge.f32.partialorder %v51_v26, 0.0 }
  0x84   :  { %v169_v43 = vsel %vm167_vm0, %v94_v36, 0  ;;  %v172_v44 = vsel %vm167_vm0, %v95_v37, 0  ;;  %v98_v45 = vpack.c.bf16 %v74_v42, %v74_v42  ;;  %v67_v46 = vmul.f32 0.2, %v51_v26 }
  0x85   :  { %199 = vmatpush.bf16.msra.mxu0 %v169_v43  ;;  %248 = vmatpush.bf16.msra.mxu1 %v172_v44  ;;  %v175_v48 = vsel %vm167_vm0, %v96_v40, 0  ;;  %v178_v49 = vsel %vm167_vm0, %v97_v41, 0  ;;  %vm60_vm8 = vcmp.ge.f32.partialorder %v52_v27, 0.0  ;;  %v68_v50 = vmul.f32 0.2, %v52_v27 }
  0x86   :  { %297 = vmatpush.bf16.msra.mxu2 %v175_v48  ;;  %346 = vmatpush.bf16.msra.mxu3 %v178_v49  ;;  %v181_v51 = vsel %vm167_vm0, %v98_v45, 0  ;;  %v75_v52 = vsel %vm59_vm7, %v51_v26, %v67_v46  ;;  %vm61_vm9 = vcmp.ge.f32.partialorder %v53_v28, 0.0  ;;  %v69_v53 = vmul.f32 0.2, %v53_v28 }
  0x87   :  { %v99_v54 = vpack.c.bf16 %v75_v52, %v75_v52  ;;  %v76_v55 = vsel %vm60_vm8, %v52_v27, %v68_v50 }
  0x88   :  { %v100_v56 = vpack.c.bf16 %v76_v55, %v76_v55  ;;  %v77_v57 = vsel %vm61_vm9, %v53_v28, %v69_v53  ;;  %748 = vmatmul.msk.bf16.vlgmr.msra.gmra.mxu0 %vm142_vm1, %v883_v47  ;;  %756 = vmatmul.msk.bf16.vlgmr.msra.gmra.mxu1 %vm142_vm1, %v883_v47 }
  0x89   :  { %395 = vmatpush.bf16.msrb.mxu0 %v181_v51  ;;  %v184_v58 = vsel %vm167_vm0, %v99_v54, 0  ;;  %v101_v59 = vpack.c.bf16 %v77_v57, %v77_v57  ;;  %764 = vmatmul.msk.bf16.vlgmr.msra.gmra.mxu2 %vm142_vm1, %v883_v47 }
  0x8a   :  { %772 = vmatmul.msk.bf16.vlgmr.msra.gmra.mxu3 %vm142_vm1, %v883_v47  ;;  %444 = vmatpush.bf16.msrb.mxu1 %v184_v58  ;;  %v187_v60 = vsel %vm167_vm0, %v100_v56, 0 }
  0x8b   :  { %493 = vmatpush.bf16.msrb.mxu2 %v187_v60  ;;  %v190_v61 = vsel %vm167_vm0, %v101_v59, 0 }
  0x8c   :  { %542 = vmatpush.bf16.msrb.mxu3 %v190_v61 }
  0x98   :  { %749 = vmatmul.msk.bf16.gmra.mxu0 %vm142_vm1, %v902_v62  ;;  %757 = vmatmul.msk.bf16.gmra.mxu1 %vm142_vm1, %v902_v62 }
  0x99   :  { %765 = vmatmul.msk.bf16.gmra.mxu2 %vm142_vm1, %v902_v62 }
  0x9a   :  { %773 = vmatmul.msk.bf16.gmra.mxu3 %vm142_vm1, %v902_v62 }
  0xa8   :  { %750 = vmatmul.msk.bf16.gmra.mxu0 %vm142_vm1, %v915_v63  ;;  %758 = vmatmul.msk.bf16.gmra.mxu1 %vm142_vm1, %v915_v63 }
  0xa9   :  { %766 = vmatmul.msk.bf16.gmra.mxu2 %vm142_vm1, %v915_v63 }
  0xaa   :  { %774 = vmatmul.msk.bf16.gmra.mxu3 %vm142_vm1, %v915_v63 }
  0xb8   :  { %751 = vmatmul.msk.bf16.gmra.mxu0 %vm142_vm1, %v928_v0  ;;  %759 = vmatmul.msk.bf16.gmra.mxu1 %vm142_vm1, %v928_v0 }
  0xb9   :  { %767 = vmatmul.msk.bf16.gmra.mxu2 %vm142_vm1, %v928_v0 }
  0xba   :  { %775 = vmatmul.msk.bf16.gmra.mxu3 %vm142_vm1, %v928_v0 }
  0xc8   :  { %752 = vmatmul.msk.bf16.gmra.mxu0 %vm142_vm1, %v941_v1  ;;  %760 = vmatmul.msk.bf16.gmra.mxu1 %vm142_vm1, %v941_v1 }
  0xc9   :  { %768 = vmatmul.msk.bf16.gmra.mxu2 %vm142_vm1, %v941_v1 }
  0xca   :  { %776 = vmatmul.msk.bf16.gmra.mxu3 %vm142_vm1, %v941_v1 }
  0xd8   :  { %753 = vmatmul.msk.bf16.gmra.mxu0 %vm142_vm1, %v954_v2  ;;  %761 = vmatmul.msk.bf16.gmra.mxu1 %vm142_vm1, %v954_v2 }
  0xd9   :  { %769 = vmatmul.msk.bf16.gmra.mxu2 %vm142_vm1, %v954_v2 }
  0xda   :  { %777 = vmatmul.msk.bf16.gmra.mxu3 %vm142_vm1, %v954_v2 }
  0xe8   :  { %754 = vmatmul.msk.bf16.gmra.mxu0 %vm142_vm1, %v967_v3  ;;  %762 = vmatmul.msk.bf16.gmra.mxu1 %vm142_vm1, %v967_v3 }
  0xe9   :  { %770 = vmatmul.msk.bf16.gmra.mxu2 %vm142_vm1, %v967_v3 }
  0xea   :  { %778 = vmatmul.msk.bf16.gmra.mxu3 %vm142_vm1, %v967_v3 }
  0xf8   :  { %755 = vmatmul.msk.bf16.gmra.mxu0 %vm142_vm1, %v980_v4  ;;  %763 = vmatmul.msk.bf16.gmra.mxu1 %vm142_vm1, %v980_v4 }
  0xf9   :  { %771 = vmatmul.msk.bf16.gmra.mxu2 %vm142_vm1, %v980_v4 }
  0xfa   :  { %779 = vmatmul.msk.bf16.gmra.mxu3 %vm142_vm1, %v980_v4 }
 0x105   :  { %v201_v5 = vpop.f32.mrf.mxu0  ;;  %v250_v6 = vpop.f32.mrf.mxu1 }
 0x106   :  { %584 = vst [vmem:[%s1442_s4] sm:$0xff] %v201_v5 }
 0x107   :  { %585 = vst [vmem:[%s1442_s4 + $0x8] sm:$0xff] %v250_v6 }
 0x108   :  { %780 = vmatmul.msk.bf16.vlgmr.msrb.gmra.mxu0 %vm142_vm1, %v883_v47  ;;  %788 = vmatmul.msk.bf16.vlgmr.msrb.gmra.mxu1 %vm142_vm1, %v883_v47 }
 0x109   :  { %796 = vmatmul.msk.bf16.vlgmr.msrb.gmra.mxu2 %vm142_vm1, %v883_v47 }
 0x10a   :  { %804 = vmatmul.msk.bf16.vlgmr.msrb.gmra.mxu3 %vm142_vm1, %v883_v47 }
 0x10c   :  { %v299_v7 = vpop.f32.mrf.mxu2 }
 0x10d   :  { %v348_v8 = vpop.f32.mrf.mxu3  ;;  %586 = vst [vmem:[%s1442_s4 + $0x10] sm:$0xff] %v299_v7  ;;  %v203_v9 = vpop.f32.mrf.mxu0 }
 0x10e   :  { %v252_v10 = vpop.f32.mrf.mxu1  ;;  %587 = vst [vmem:[%s1442_s4 + $0x18] sm:$0xff] %v348_v8 }
 0x10f   :  { %592 = vst [vmem:[%s1442_s4 + $0x40] sm:$0xff] %v203_v9 }
 0x110   :  { %593 = vst [vmem:[%s1442_s4 + $0x48] sm:$0xff] %v252_v10 }
 0x114   :  { %v301_v11 = vpop.f32.mrf.mxu2 }
 0x115   :  { %v350_v12 = vpop.f32.mrf.mxu3  ;;  %594 = vst [vmem:[%s1442_s4 + $0x50] sm:$0xff] %v301_v11  ;;  %v206_v13 = vpop.f32.mrf.mxu0 }
 0x116   :  { %v255_v14 = vpop.f32.mrf.mxu1  ;;  %595 = vst [vmem:[%s1442_s4 + $0x58] sm:$0xff] %v350_v12 }
 0x117   :  { %600 = vst [vmem:[%s1442_s4 + $0x80] sm:$0xff] %v206_v13 }
 0x118   :  { %601 = vst [vmem:[%s1442_s4 + $0x88] sm:$0xff] %v255_v14  ;;  %781 = vmatmul.msk.bf16.gmra.mxu0 %vm142_vm1, %v902_v62  ;;  %789 = vmatmul.msk.bf16.gmra.mxu1 %vm142_vm1, %v902_v62 }
 0x119   :  { %797 = vmatmul.msk.bf16.gmra.mxu2 %vm142_vm1, %v902_v62 }
 0x11a   :  { %805 = vmatmul.msk.bf16.gmra.mxu3 %vm142_vm1, %v902_v62 }
 0x11c   :  { %v304_v15 = vpop.f32.mrf.mxu2 }
 0x11d   :  { %v353_v16 = vpop.f32.mrf.mxu3  ;;  %602 = vst [vmem:[%s1442_s4 + $0x90] sm:$0xff] %v304_v15  ;;  %v208_v17 = vpop.f32.mrf.mxu0 }
 0x11e   :  { %v257_v18 = vpop.f32.mrf.mxu1  ;;  %603 = vst [vmem:[%s1442_s4 + $0x98] sm:$0xff] %v353_v16 }
 0x11f   :  { %608 = vst [vmem:[%s1442_s4 + $0xc0] sm:$0xff] %v208_v17 }
 0x120   :  { %609 = vst [vmem:[%s1442_s4 + $0xc8] sm:$0xff] %v257_v18 }
 0x124   :  { %v306_v19 = vpop.f32.mrf.mxu2 }
 0x125   :  { %v355_v20 = vpop.f32.mrf.mxu3  ;;  %610 = vst [vmem:[%s1442_s4 + $0xd0] sm:$0xff] %v306_v19  ;;  %v211_v21 = vpop.f32.mrf.mxu0 }
 0x126   :  { %v260_v22 = vpop.f32.mrf.mxu1  ;;  %611 = vst [vmem:[%s1442_s4 + $0xd8] sm:$0xff] %v355_v20 }
 0x127   :  { %616 = vst [vmem:[%s1442_s4 + $0x100] sm:$0xff] %v211_v21 }
 0x128   :  { %617 = vst [vmem:[%s1442_s4 + $0x108] sm:$0xff] %v260_v22  ;;  %782 = vmatmul.msk.bf16.gmra.mxu0 %vm142_vm1, %v915_v63  ;;  %790 = vmatmul.msk.bf16.gmra.mxu1 %vm142_vm1, %v915_v63 }
 0x129   :  { %798 = vmatmul.msk.bf16.gmra.mxu2 %vm142_vm1, %v915_v63 }
 0x12a   :  { %806 = vmatmul.msk.bf16.gmra.mxu3 %vm142_vm1, %v915_v63 }
 0x12c   :  { %v309_v23 = vpop.f32.mrf.mxu2 }
 0x12d   :  { %v358_v24 = vpop.f32.mrf.mxu3  ;;  %618 = vst [vmem:[%s1442_s4 + $0x110] sm:$0xff] %v309_v23  ;;  %v213_v25 = vpop.f32.mrf.mxu0 }
 0x12e   :  { %v262_v26 = vpop.f32.mrf.mxu1  ;;  %619 = vst [vmem:[%s1442_s4 + $0x118] sm:$0xff] %v358_v24 }
 0x12f   :  { %624 = vst [vmem:[%s1442_s4 + $0x140] sm:$0xff] %v213_v25 }
 0x130   :  { %625 = vst [vmem:[%s1442_s4 + $0x148] sm:$0xff] %v262_v26 }
 0x134   :  { %v311_v27 = vpop.f32.mrf.mxu2 }
 0x135   :  { %v360_v28 = vpop.f32.mrf.mxu3  ;;  %626 = vst [vmem:[%s1442_s4 + $0x150] sm:$0xff] %v311_v27  ;;  %v216_v29 = vpop.f32.mrf.mxu0 }
 0x136   :  { %v265_v30 = vpop.f32.mrf.mxu1  ;;  %627 = vst [vmem:[%s1442_s4 + $0x158] sm:$0xff] %v360_v28 }
 0x137   :  { %632 = vst [vmem:[%s1442_s4 + $0x180] sm:$0xff] %v216_v29 }
 0x138   :  { %633 = vst [vmem:[%s1442_s4 + $0x188] sm:$0xff] %v265_v30  ;;  %783 = vmatmul.msk.bf16.gmra.mxu0 %vm142_vm1, %v928_v0  ;;  %791 = vmatmul.msk.bf16.gmra.mxu1 %vm142_vm1, %v928_v0 }
 0x139   :  { %799 = vmatmul.msk.bf16.gmra.mxu2 %vm142_vm1, %v928_v0 }
 0x13a   :  { %807 = vmatmul.msk.bf16.gmra.mxu3 %vm142_vm1, %v928_v0 }
 0x13c   :  { %v314_v31 = vpop.f32.mrf.mxu2 }
 0x13d   :  { %v363_v32 = vpop.f32.mrf.mxu3  ;;  %634 = vst [vmem:[%s1442_s4 + $0x190] sm:$0xff] %v314_v31  ;;  %v218_v33 = vpop.f32.mrf.mxu0 }
 0x13e   :  { %v267_v34 = vpop.f32.mrf.mxu1  ;;  %635 = vst [vmem:[%s1442_s4 + $0x198] sm:$0xff] %v363_v32 }
 0x13f   :  { %640 = vst [vmem:[%s1442_s4 + $0x1c0] sm:$0xff] %v218_v33 }
 0x140   :  { %641 = vst [vmem:[%s1442_s4 + $0x1c8] sm:$0xff] %v267_v34 }
 0x144   :  { %v316_v35 = vpop.f32.mrf.mxu2 }
 0x145   :  { %v365_v36 = vpop.f32.mrf.mxu3  ;;  %642 = vst [vmem:[%s1442_s4 + $0x1d0] sm:$0xff] %v316_v35  ;;  %v221_v37 = vpop.f32.mrf.mxu0 }
 0x146   :  { %v270_v38 = vpop.f32.mrf.mxu1  ;;  %643 = vst [vmem:[%s1442_s4 + $0x1d8] sm:$0xff] %v365_v36 }
 0x147   :  { %648 = vst [vmem:[%s1442_s4 + $0x200] sm:$0xff] %v221_v37 }
 0x148   :  { %649 = vst [vmem:[%s1442_s4 + $0x208] sm:$0xff] %v270_v38  ;;  %784 = vmatmul.msk.bf16.gmra.mxu0 %vm142_vm1, %v941_v1  ;;  %792 = vmatmul.msk.bf16.gmra.mxu1 %vm142_vm1, %v941_v1 }
 0x149   :  { %800 = vmatmul.msk.bf16.gmra.mxu2 %vm142_vm1, %v941_v1 }
 0x14a   :  { %808 = vmatmul.msk.bf16.gmra.mxu3 %vm142_vm1, %v941_v1 }
 0x14c   :  { %v319_v39 = vpop.f32.mrf.mxu2 }
 0x14d   :  { %v368_v40 = vpop.f32.mrf.mxu3  ;;  %650 = vst [vmem:[%s1442_s4 + $0x210] sm:$0xff] %v319_v39  ;;  %v223_v41 = vpop.f32.mrf.mxu0 }
 0x14e   :  { %v272_v42 = vpop.f32.mrf.mxu1  ;;  %651 = vst [vmem:[%s1442_s4 + $0x218] sm:$0xff] %v368_v40 }
 0x14f   :  { %656 = vst [vmem:[%s1442_s4 + $0x240] sm:$0xff] %v223_v41 }
 0x150   :  { %657 = vst [vmem:[%s1442_s4 + $0x248] sm:$0xff] %v272_v42 }
 0x154   :  { %v321_v43 = vpop.f32.mrf.mxu2 }
 0x155   :  { %v370_v44 = vpop.f32.mrf.mxu3  ;;  %658 = vst [vmem:[%s1442_s4 + $0x250] sm:$0xff] %v321_v43  ;;  %v226_v45 = vpop.f32.mrf.mxu0 }
 0x156   :  { %v275_v46 = vpop.f32.mrf.mxu1  ;;  %659 = vst [vmem:[%s1442_s4 + $0x258] sm:$0xff] %v370_v44 }
 0x157   :  { %664 = vst [vmem:[%s1442_s4 + $0x280] sm:$0xff] %v226_v45 }
 0x158   :  { %665 = vst [vmem:[%s1442_s4 + $0x288] sm:$0xff] %v275_v46  ;;  %785 = vmatmul.msk.bf16.gmra.mxu0 %vm142_vm1, %v954_v2  ;;  %793 = vmatmul.msk.bf16.gmra.mxu1 %vm142_vm1, %v954_v2 }
 0x159   :  { %801 = vmatmul.msk.bf16.gmra.mxu2 %vm142_vm1, %v954_v2 }
 0x15a   :  { %809 = vmatmul.msk.bf16.gmra.mxu3 %vm142_vm1, %v954_v2 }
 0x15c   :  { %v324_v47 = vpop.f32.mrf.mxu2 }
 0x15d   :  { %v373_v48 = vpop.f32.mrf.mxu3  ;;  %666 = vst [vmem:[%s1442_s4 + $0x290] sm:$0xff] %v324_v47  ;;  %v228_v49 = vpop.f32.mrf.mxu0 }
 0x15e   :  { %v277_v50 = vpop.f32.mrf.mxu1  ;;  %667 = vst [vmem:[%s1442_s4 + $0x298] sm:$0xff] %v373_v48 }
 0x15f   :  { %672 = vst [vmem:[%s1442_s4 + $0x2c0] sm:$0xff] %v228_v49 }
 0x160   :  { %673 = vst [vmem:[%s1442_s4 + $0x2c8] sm:$0xff] %v277_v50 }
 0x164   :  { %v326_v51 = vpop.f32.mrf.mxu2 }
 0x165   :  { %v375_v52 = vpop.f32.mrf.mxu3  ;;  %674 = vst [vmem:[%s1442_s4 + $0x2d0] sm:$0xff] %v326_v51  ;;  %v231_v53 = vpop.f32.mrf.mxu0 }
 0x166   :  { %v280_v54 = vpop.f32.mrf.mxu1  ;;  %675 = vst [vmem:[%s1442_s4 + $0x2d8] sm:$0xff] %v375_v52 }
 0x167   :  { %680 = vst [vmem:[%s1442_s4 + $0x300] sm:$0xff] %v231_v53 }
 0x168   :  { %681 = vst [vmem:[%s1442_s4 + $0x308] sm:$0xff] %v280_v54  ;;  %786 = vmatmul.msk.bf16.gmra.mxu0 %vm142_vm1, %v967_v3  ;;  %794 = vmatmul.msk.bf16.gmra.mxu1 %vm142_vm1, %v967_v3 }
 0x169   :  { %802 = vmatmul.msk.bf16.gmra.mxu2 %vm142_vm1, %v967_v3 }
 0x16a   :  { %810 = vmatmul.msk.bf16.gmra.mxu3 %vm142_vm1, %v967_v3 }
 0x16c   :  { %v329_v55 = vpop.f32.mrf.mxu2 }
 0x16d   :  { %v378_v56 = vpop.f32.mrf.mxu3  ;;  %682 = vst [vmem:[%s1442_s4 + $0x310] sm:$0xff] %v329_v55  ;;  %v233_v57 = vpop.f32.mrf.mxu0 }
 0x16e   :  { %v282_v58 = vpop.f32.mrf.mxu1  ;;  %683 = vst [vmem:[%s1442_s4 + $0x318] sm:$0xff] %v378_v56 }
 0x16f   :  { %688 = vst [vmem:[%s1442_s4 + $0x340] sm:$0xff] %v233_v57 }
 0x170   :  { %689 = vst [vmem:[%s1442_s4 + $0x348] sm:$0xff] %v282_v58 }
 0x174   :  { %v331_v59 = vpop.f32.mrf.mxu2 }
 0x175   :  { %v380_v60 = vpop.f32.mrf.mxu3  ;;  %690 = vst [vmem:[%s1442_s4 + $0x350] sm:$0xff] %v331_v59  ;;  %v236_v61 = vpop.f32.mrf.mxu0 }
 0x176   :  { %v285_v62 = vpop.f32.mrf.mxu1  ;;  %691 = vst [vmem:[%s1442_s4 + $0x358] sm:$0xff] %v380_v60 }
 0x177   :  { %696 = vst [vmem:[%s1442_s4 + $0x380] sm:$0xff] %v236_v61 }
 0x178   :  { %697 = vst [vmem:[%s1442_s4 + $0x388] sm:$0xff] %v285_v62  ;;  %787 = vmatmul.msk.bf16.gmra.mxu0 %vm142_vm1, %v980_v4  ;;  %795 = vmatmul.msk.bf16.gmra.mxu1 %vm142_vm1, %v980_v4 }
 0x179   :  { %803 = vmatmul.msk.bf16.gmra.mxu2 %vm142_vm1, %v980_v4 }
 0x17a   :  { %811 = vmatmul.msk.bf16.gmra.mxu3 %vm142_vm1, %v980_v4 }
 0x17c   :  { %v334_v63 = vpop.f32.mrf.mxu2 }
 0x17d   :  { %v383_v0 = vpop.f32.mrf.mxu3  ;;  %698 = vst [vmem:[%s1442_s4 + $0x390] sm:$0xff] %v334_v63  ;;  %v238_v1 = vpop.f32.mrf.mxu0 }
 0x17e   :  { %v287_v2 = vpop.f32.mrf.mxu1  ;;  %699 = vst [vmem:[%s1442_s4 + $0x398] sm:$0xff] %v383_v0 }
 0x17f   :  { %704 = vst [vmem:[%s1442_s4 + $0x3c0] sm:$0xff] %v238_v1 }
 0x180   :  { %705 = vst [vmem:[%s1442_s4 + $0x3c8] sm:$0xff] %v287_v2 }
 0x184   :  { %v336_v3 = vpop.f32.mrf.mxu2 }
 0x185   :  { %v385_v4 = vpop.f32.mrf.mxu3  ;;  %706 = vst [vmem:[%s1442_s4 + $0x3d0] sm:$0xff] %v336_v3  ;;  %v397_v5 = vpop.f32.mrf.mxu0 }
 0x186   :  { %v446_v6 = vpop.f32.mrf.mxu1  ;;  %707 = vst [vmem:[%s1442_s4 + $0x3d8] sm:$0xff] %v385_v4 }
 0x187   :  { %588 = vst [vmem:[%s1442_s4 + $0x20] sm:$0xff] %v397_v5 }
 0x188   :  { %589 = vst [vmem:[%s1442_s4 + $0x28] sm:$0xff] %v446_v6 }
 0x18c   :  { %v495_v7 = vpop.f32.mrf.mxu2 }
 0x18d   :  { %v544_v8 = vpop.f32.mrf.mxu3  ;;  %590 = vst [vmem:[%s1442_s4 + $0x30] sm:$0xff] %v495_v7  ;;  %v399_v9 = vpop.f32.mrf.mxu0 }
 0x18e   :  { %v448_v10 = vpop.f32.mrf.mxu1  ;;  %591 = vst [vmem:[%s1442_s4 + $0x38] sm:$0xff] %v544_v8 }
 0x18f   :  { %596 = vst [vmem:[%s1442_s4 + $0x60] sm:$0xff] %v399_v9 }
 0x190   :  { %597 = vst [vmem:[%s1442_s4 + $0x68] sm:$0xff] %v448_v10 }
 0x194   :  { %v497_v11 = vpop.f32.mrf.mxu2 }
 0x195   :  { %v546_v12 = vpop.f32.mrf.mxu3  ;;  %598 = vst [vmem:[%s1442_s4 + $0x70] sm:$0xff] %v497_v11  ;;  %v402_v13 = vpop.f32.mrf.mxu0 }
 0x196   :  { %v451_v14 = vpop.f32.mrf.mxu1  ;;  %599 = vst [vmem:[%s1442_s4 + $0x78] sm:$0xff] %v546_v12 }
 0x197   :  { %604 = vst [vmem:[%s1442_s4 + $0xa0] sm:$0xff] %v402_v13 }
 0x198   :  { %605 = vst [vmem:[%s1442_s4 + $0xa8] sm:$0xff] %v451_v14 }
 0x19c   :  { %v500_v15 = vpop.f32.mrf.mxu2 }
 0x19d   :  { %v549_v16 = vpop.f32.mrf.mxu3  ;;  %606 = vst [vmem:[%s1442_s4 + $0xb0] sm:$0xff] %v500_v15  ;;  %v404_v17 = vpop.f32.mrf.mxu0 }
 0x19e   :  { %v453_v18 = vpop.f32.mrf.mxu1  ;;  %607 = vst [vmem:[%s1442_s4 + $0xb8] sm:$0xff] %v549_v16 }
 0x19f   :  { %612 = vst [vmem:[%s1442_s4 + $0xe0] sm:$0xff] %v404_v17 }
 0x1a0   :  { %613 = vst [vmem:[%s1442_s4 + $0xe8] sm:$0xff] %v453_v18 }
 0x1a4   :  { %v502_v19 = vpop.f32.mrf.mxu2 }
 0x1a5   :  { %v551_v20 = vpop.f32.mrf.mxu3  ;;  %614 = vst [vmem:[%s1442_s4 + $0xf0] sm:$0xff] %v502_v19  ;;  %v407_v21 = vpop.f32.mrf.mxu0 }
 0x1a6   :  { %v456_v22 = vpop.f32.mrf.mxu1  ;;  %615 = vst [vmem:[%s1442_s4 + $0xf8] sm:$0xff] %v551_v20 }
 0x1a7   :  { %620 = vst [vmem:[%s1442_s4 + $0x120] sm:$0xff] %v407_v21 }
 0x1a8   :  { %621 = vst [vmem:[%s1442_s4 + $0x128] sm:$0xff] %v456_v22 }
 0x1ac   :  { %v505_v23 = vpop.f32.mrf.mxu2 }
 0x1ad   :  { %v554_v24 = vpop.f32.mrf.mxu3  ;;  %622 = vst [vmem:[%s1442_s4 + $0x130] sm:$0xff] %v505_v23  ;;  %v409_v25 = vpop.f32.mrf.mxu0 }
 0x1ae   :  { %v458_v26 = vpop.f32.mrf.mxu1  ;;  %623 = vst [vmem:[%s1442_s4 + $0x138] sm:$0xff] %v554_v24 }
 0x1af   :  { %628 = vst [vmem:[%s1442_s4 + $0x160] sm:$0xff] %v409_v25 }
 0x1b0   :  { %629 = vst [vmem:[%s1442_s4 + $0x168] sm:$0xff] %v458_v26 }
 0x1b4   :  { %v507_v27 = vpop.f32.mrf.mxu2 }
 0x1b5   :  { %v556_v28 = vpop.f32.mrf.mxu3  ;;  %630 = vst [vmem:[%s1442_s4 + $0x170] sm:$0xff] %v507_v27  ;;  %v412_v29 = vpop.f32.mrf.mxu0 }
 0x1b6   :  { %v461_v30 = vpop.f32.mrf.mxu1  ;;  %631 = vst [vmem:[%s1442_s4 + $0x178] sm:$0xff] %v556_v28 }
 0x1b7   :  { %636 = vst [vmem:[%s1442_s4 + $0x1a0] sm:$0xff] %v412_v29 }
 0x1b8   :  { %637 = vst [vmem:[%s1442_s4 + $0x1a8] sm:$0xff] %v461_v30 }
 0x1bc   :  { %v510_v31 = vpop.f32.mrf.mxu2 }
 0x1bd   :  { %v559_v32 = vpop.f32.mrf.mxu3  ;;  %638 = vst [vmem:[%s1442_s4 + $0x1b0] sm:$0xff] %v510_v31  ;;  %v414_v33 = vpop.f32.mrf.mxu0 }
 0x1be   :  { %v463_v34 = vpop.f32.mrf.mxu1  ;;  %639 = vst [vmem:[%s1442_s4 + $0x1b8] sm:$0xff] %v559_v32 }
 0x1bf   :  { %644 = vst [vmem:[%s1442_s4 + $0x1e0] sm:$0xff] %v414_v33 }
 0x1c0   :  { %645 = vst [vmem:[%s1442_s4 + $0x1e8] sm:$0xff] %v463_v34 }
 0x1c4   :  { %v512_v35 = vpop.f32.mrf.mxu2 }
 0x1c5   :  { %v561_v36 = vpop.f32.mrf.mxu3  ;;  %646 = vst [vmem:[%s1442_s4 + $0x1f0] sm:$0xff] %v512_v35  ;;  %v417_v37 = vpop.f32.mrf.mxu0 }
 0x1c6   :  { %v466_v38 = vpop.f32.mrf.mxu1  ;;  %647 = vst [vmem:[%s1442_s4 + $0x1f8] sm:$0xff] %v561_v36 }
 0x1c7   :  { %652 = vst [vmem:[%s1442_s4 + $0x220] sm:$0xff] %v417_v37 }
 0x1c8   :  { %653 = vst [vmem:[%s1442_s4 + $0x228] sm:$0xff] %v466_v38 }
 0x1cc   :  { %v515_v39 = vpop.f32.mrf.mxu2 }
 0x1cd   :  { %v564_v40 = vpop.f32.mrf.mxu3  ;;  %654 = vst [vmem:[%s1442_s4 + $0x230] sm:$0xff] %v515_v39  ;;  %v419_v41 = vpop.f32.mrf.mxu0 }
 0x1ce   :  { %v468_v42 = vpop.f32.mrf.mxu1  ;;  %655 = vst [vmem:[%s1442_s4 + $0x238] sm:$0xff] %v564_v40 }
 0x1cf   :  { %660 = vst [vmem:[%s1442_s4 + $0x260] sm:$0xff] %v419_v41 }
 0x1d0   :  { %661 = vst [vmem:[%s1442_s4 + $0x268] sm:$0xff] %v468_v42 }
 0x1d4   :  { %v517_v43 = vpop.f32.mrf.mxu2 }
 0x1d5   :  { %v566_v44 = vpop.f32.mrf.mxu3  ;;  %662 = vst [vmem:[%s1442_s4 + $0x270] sm:$0xff] %v517_v43  ;;  %v422_v45 = vpop.f32.mrf.mxu0 }
 0x1d6   :  { %v471_v46 = vpop.f32.mrf.mxu1  ;;  %663 = vst [vmem:[%s1442_s4 + $0x278] sm:$0xff] %v566_v44 }
 0x1d7   :  { %668 = vst [vmem:[%s1442_s4 + $0x2a0] sm:$0xff] %v422_v45 }
 0x1d8   :  { %669 = vst [vmem:[%s1442_s4 + $0x2a8] sm:$0xff] %v471_v46 }
 0x1dc   :  { %v520_v47 = vpop.f32.mrf.mxu2 }
 0x1dd   :  { %v569_v48 = vpop.f32.mrf.mxu3  ;;  %670 = vst [vmem:[%s1442_s4 + $0x2b0] sm:$0xff] %v520_v47  ;;  %v424_v49 = vpop.f32.mrf.mxu0 }
 0x1de   :  { %v473_v50 = vpop.f32.mrf.mxu1  ;;  %671 = vst [vmem:[%s1442_s4 + $0x2b8] sm:$0xff] %v569_v48 }
 0x1df   :  { %676 = vst [vmem:[%s1442_s4 + $0x2e0] sm:$0xff] %v424_v49 }
 0x1e0   :  { %677 = vst [vmem:[%s1442_s4 + $0x2e8] sm:$0xff] %v473_v50 }
 0x1e4   :  { %v522_v51 = vpop.f32.mrf.mxu2 }
 0x1e5   :  { %v571_v52 = vpop.f32.mrf.mxu3  ;;  %678 = vst [vmem:[%s1442_s4 + $0x2f0] sm:$0xff] %v522_v51  ;;  %v427_v53 = vpop.f32.mrf.mxu0 }
 0x1e6   :  { %v476_v54 = vpop.f32.mrf.mxu1  ;;  %679 = vst [vmem:[%s1442_s4 + $0x2f8] sm:$0xff] %v571_v52 }
 0x1e7   :  { %684 = vst [vmem:[%s1442_s4 + $0x320] sm:$0xff] %v427_v53 }
 0x1e8   :  { %685 = vst [vmem:[%s1442_s4 + $0x328] sm:$0xff] %v476_v54 }
 0x1ec   :  { %v525_v55 = vpop.f32.mrf.mxu2 }
 0x1ed   :  { %v574_v56 = vpop.f32.mrf.mxu3  ;;  %686 = vst [vmem:[%s1442_s4 + $0x330] sm:$0xff] %v525_v55  ;;  %v429_v57 = vpop.f32.mrf.mxu0 }
 0x1ee   :  { %v478_v58 = vpop.f32.mrf.mxu1  ;;  %687 = vst [vmem:[%s1442_s4 + $0x338] sm:$0xff] %v574_v56 }
 0x1ef   :  { %692 = vst [vmem:[%s1442_s4 + $0x360] sm:$0xff] %v429_v57 }
 0x1f0   :  { %693 = vst [vmem:[%s1442_s4 + $0x368] sm:$0xff] %v478_v58 }
 0x1f4   :  { %v527_v59 = vpop.f32.mrf.mxu2 }
 0x1f5   :  { %v576_v60 = vpop.f32.mrf.mxu3  ;;  %694 = vst [vmem:[%s1442_s4 + $0x370] sm:$0xff] %v527_v59  ;;  %v432_v61 = vpop.f32.mrf.mxu0 }
 0x1f6   :  { %v481_v62 = vpop.f32.mrf.mxu1  ;;  %695 = vst [vmem:[%s1442_s4 + $0x378] sm:$0xff] %v576_v60 }
 0x1f7   :  { %700 = vst [vmem:[%s1442_s4 + $0x3a0] sm:$0xff] %v432_v61 }
 0x1f8   :  { %701 = vst [vmem:[%s1442_s4 + $0x3a8] sm:$0xff] %v481_v62 }
 0x1fc   :  { %v530_v63 = vpop.f32.mrf.mxu2 }
 0x1fd   :  { %v579_v0 = vpop.f32.mrf.mxu3  ;;  %702 = vst [vmem:[%s1442_s4 + $0x3b0] sm:$0xff] %v530_v63  ;;  %v434_v1 = vpop.f32.mrf.mxu0 }
 0x1fe   :  { %v483_v2 = vpop.f32.mrf.mxu1  ;;  %703 = vst [vmem:[%s1442_s4 + $0x3b8] sm:$0xff] %v579_v0 }
 0x1ff   :  { %708 = vst [vmem:[%s1442_s4 + $0x3e0] sm:$0xff] %v434_v1 }
 0x200   :  { %709 = vst [vmem:[%s1442_s4 + $0x3e8] sm:$0xff] %v483_v2 }
 0x204   :  { %v532_v3 = vpop.f32.mrf.mxu2 }
 0x205   :  { %v581_v4 = vpop.f32.mrf.mxu3  ;;  %710 = vst [vmem:[%s1442_s4 + $0x3f0] sm:$0xff] %v532_v3 }
 0x206   :  { %711 = vst [vmem:[%s1442_s4 + $0x3f8] sm:$0xff] %v581_v4 }

// kernel: decoder_forward.6
= control target key start
LH: loop header
LB: loop body
LE: loop exit
PB: predicated region body
PF: predicated region fallthrough
CT: control target
= control target key end

     0   :  { %s1507_s15 = smov 0   ;;  %s1509_s16 = smov 0   ;;  %s2148_s0 = inlined_call_operand.vmem [shape: f32[8,8192], index: 0, kind: input, shape index: {}]   ;;  %s2149_s1 = inlined_call_operand.vmem [shape: bf16[64,8], index: 1, kind: input, shape index: {}]   ;;  %s2150_s2 = inlined_call_operand.vmem [shape: f32[8,1], index: 2, kind: input, shape index: {}]   ;;  %s2151_s3 = inlined_call_operand.vmem [shape: f32[8,1], index: 3, kind: input, shape index: {}]   ;;  %s2152_s4 = inlined_call_operand.vmem [shape: f32[64,8192], index: 4, kind: output, shape index: {}]  }
   0x1   :  { %s1511_s17 = smov 0  }
   0x2 LB: > { %s1520_s18 = sadd.s32 4294967295, %s1479_s17   ;;  %s1522_s19 = sadd.s32 1, %s1479_s17   ;;  %s1479_s17 = sphi %s1511_s17, %s2156_s17   ;;  %s1475_s16 = sphi %s1509_s16, %s2155_s16   ;;  %s1471_s15 = sphi %s1507_s15, %s2154_s15  }
   0x3   : > { %s107_s20 = ssub.s32 %s1479_s17, %s1522_s19  ;;  %s110_s21 = sadd.s32 1, %s1475_s16 }
   0x4   : > { %p108_p0 = scmp.eq.s32.totalorder %s107_s20, 0  ;;  %p120_p1 = scmp.ne.s32.totalorder %s1475_s16, %s1471_s15 }
   0x5   : > { %p121_p2 = scmp.eq.s32.totalorder %s1520_s18, 3  ;;  %p1337_p3 = scmp.ge.s32.totalorder %s1479_s17, 1 }
   0x6   : > { %s1530_s22 = scalar_select %p108_p0, %s1475_s16, %s110_s21  }
   0x7   : > { %p1532_p4 = por %p121_p2, %p120_p1  ;;  %p163_p5 = scmp.lt.s32.totalorder %s1479_s17, 5 }
   0x9   : > { %p164_p6 = pnand %p1337_p3, %p163_p5 }
   0xa   : > { %s1339_s28 = sshll.u32 (!%p164_p6), %s1520_s18, 4  ;;  %s185_s17 = sand.u32 (!%p164_p6), 1, %s1471_s15  }
   0xb   : > { %167 = sbr.rel (%p164_p6) target bundleno = 599 (0x257), region = 36  ;;  %p189_p7 = scmp.lt.s32.totalorder (!%p164_p6), %s1339_s28, 63 }
   0xc   : > { %s1338_s20 = sshll.u32 (!%p164_p6), %s185_s17, 10 }
   0xd   : > { %s1680_s21 = scalar_lea.vmem (!%p164_p6), [#allocation2], %s1338_s20 }
  0x10   : > { %v212_v0 = vld [vmem:[%s2150_s2] sm:$0xff]  ;;  %v1481_v1 = vmov 0   ;;  %s2158_s28 = smov (!%p189_p7, %s1339_s28), 63  ;;  %vm361_vm0 = vcmask 1043456   ;;  %vm348_vm1 = vcmask 64512   ;;  %s1430_s15 = sshll.u32 (%p1532_p4), %s1520_s18, 7 }
  0x11   : > { %1456 = vset.pattern.permute.xlu0 %v1481_v1  ;;  %v234_v2 = vld [vmem:[%s2151_s3] sm:$0xff]  ;;  %s1340_s29 = sshll.u32 %s2158_s28, 3  ;;  %s1882_s26 = scalar_lea.vmem (%p1532_p4), %s2152_s4, %s1430_s15 }
  0x12   : > { %215 = vperm.xlu0 %1456, %v212_v0   ;;  %s192_s6 = scalar_lea.vmem %s2148_s0, %s1340_s29  ;;  %v1571_v63 = vld [vmem:[%s2149_s1] sm:$0xff] }
  0x13   : > { %v208_v4 = vld [vmem:[%s192_s6 + $0x60] sm:$0xff]  ;;  %v209_v5 = vld [vmem:[%s192_s6 + $0x68] sm:$0xff]  ;;  %v210_v6 = vld [vmem:[%s192_s6 + $0x70] sm:$0xff] }
  0x14   : > { %v211_v7 = vld [vmem:[%s192_s6 + $0x78] sm:$0xff]  ;;  %v196_v8 = vld [vmem:[%s192_s6] sm:$0xff]  ;;  %v197_v9 = vld [vmem:[%s192_s6 + $0x8] sm:$0xff] }
  0x15   : > { %v198_v10 = vld [vmem:[%s192_s6 + $0x10] sm:$0xff]  ;;  %v199_v11 = vld [vmem:[%s192_s6 + $0x18] sm:$0xff]  ;;  %v200_v12 = vld [vmem:[%s192_s6 + $0x20] sm:$0xff] }
  0x16   : > { %v201_v13 = vld [vmem:[%s192_s6 + $0x28] sm:$0xff]  ;;  %v202_v14 = vld [vmem:[%s192_s6 + $0x30] sm:$0xff]  ;;  %v203_v15 = vld [vmem:[%s192_s6 + $0x38] sm:$0xff] }
  0x17   : > { %v204_v16 = vld [vmem:[%s192_s6 + $0x40] sm:$0xff]  ;;  %v205_v21 = vld [vmem:[%s192_s6 + $0x48] sm:$0xff]  ;;  %v206_v22 = vld [vmem:[%s192_s6 + $0x50] sm:$0xff] }
  0x18   : > { %v207_v23 = vld [vmem:[%s192_s6 + $0x58] sm:$0xff] }
  0x1a   : > { %237 = vperm.xlu0 %1456, %v234_v2  }
  0x84   : > { %v216_v3 = vpop.permute.xlu0 %215 }
  0x85   : > { %v1546_v17 = vmul.f32 %v216_v3, %v208_v4  ;;  %v1548_v18 = vmul.f32 %v216_v3, %v209_v5  ;;  %v1550_v19 = vmul.f32 %v216_v3, %v210_v6  ;;  %v1552_v20 = vmul.f32 %v216_v3, %v211_v7 }
  0x86   : > { %v218_v24 = vmul.f32 %v216_v3, %v196_v8  ;;  %v219_v25 = vmul.f32 %v216_v3, %v197_v9  ;;  %v220_v26 = vmul.f32 %v216_v3, %v198_v10  ;;  %v221_v27 = vmul.f32 %v216_v3, %v199_v11 }
  0x87   : > { %v222_v28 = vmul.f32 %v216_v3, %v200_v12  ;;  %v223_v29 = vmul.f32 %v216_v3, %v201_v13  ;;  %v224_v30 = vmul.f32 %v216_v3, %v202_v14  ;;  %v225_v31 = vmul.f32 %v216_v3, %v203_v15 }
  0x88   : > { %v226_v33 = vmul.f32 %v216_v3, %v204_v16  ;;  %v227_v34 = vmul.f32 %v216_v3, %v205_v21  ;;  %v228_v35 = vmul.f32 %v216_v3, %v206_v22  ;;  %v1556_v36 = vmul.f32 %v216_v3, %v207_v23 }
  0x8c   : > { %v1554_v32 = vpop.permute.xlu0 %237 }
  0x8d   : > { %v240_v37 = vadd.f32 %v1554_v32, %v218_v24  ;;  %v241_v38 = vadd.f32 %v1554_v32, %v219_v25  ;;  %v242_v39 = vadd.f32 %v1554_v32, %v220_v26  ;;  %v243_v40 = vadd.f32 %v1554_v32, %v221_v27 }
  0x8e   : > { %v244_v41 = vadd.f32 %v1554_v32, %v222_v28  ;;  %v245_v42 = vadd.f32 %v1554_v32, %v223_v29  ;;  %v246_v43 = vadd.f32 %v1554_v32, %v224_v30  ;;  %v247_v44 = vadd.f32 %v1554_v32, %v225_v31 }
  0x8f   : > { %vm256_vm2 = vcmp.ge.f32.partialorder %v240_v37, 0.0  ;;  %v272_v45 = vmul.f32 0.2, %v240_v37  ;;  %vm257_vm3 = vcmp.ge.f32.partialorder %v241_v38, 0.0  ;;  %v273_v46 = vmul.f32 0.2, %v241_v38 }
  0x90   : > { %vm258_vm4 = vcmp.ge.f32.partialorder %v242_v39, 0.0  ;;  %v274_v47 = vmul.f32 0.2, %v242_v39  ;;  %vm259_vm5 = vcmp.ge.f32.partialorder %v243_v40, 0.0  ;;  %v275_v48 = vmul.f32 0.2, %v243_v40 }
  0x91   : > { %v288_v49 = vsel %vm256_vm2, %v240_v37, %v272_v45  ;;  %v289_v50 = vsel %vm257_vm3, %v241_v38, %v273_v46  ;;  %vm260_vm6 = vcmp.ge.f32.partialorder %v244_v41, 0.0  ;;  %v276_v51 = vmul.f32 0.2, %v244_v41 }
  0x92   : > { %v312_v52 = vpack.c.bf16 %v288_v49, %v288_v49  ;;  %v313_v53 = vpack.c.bf16 %v289_v50, %v289_v50  ;;  %v290_v54 = vsel %vm258_vm4, %v242_v39, %v274_v47  ;;  %v291_v55 = vsel %vm259_vm5, %v243_v40, %v275_v48 }
  0x93   : > { %v314_v56 = vpack.c.bf16 %v290_v54, %v290_v54  ;;  %v315_v57 = vpack.c.bf16 %v291_v55, %v291_v55  ;;  %v292_v58 = vsel %vm260_vm6, %v244_v41, %v276_v51  ;;  %vm261_vm7 = vcmp.ge.f32.partialorder %v245_v42, 0.0  ;;  %v1624_v55 = vld [vmem:[%s2149_s1 + $0x10] sm:$0xff] }
  0x94   : > { %v363_v59 = vsel %vm361_vm0, %v312_v52, 0  ;;  %v366_v60 = vsel %vm361_vm0, %v313_v53, 0  ;;  %v316_v61 = vpack.c.bf16 %v292_v58, %v292_v58  ;;  %v277_v62 = vmul.f32 0.2, %v245_v42 }
  0x95   : > { %417 = vmatpush.bf16.msra.mxu0 %v363_v59  ;;  %446 = vmatpush.bf16.msra.mxu1 %v366_v60  ;;  %v369_v0 = vsel %vm361_vm0, %v314_v56, 0  ;;  %v372_v1 = vsel %vm361_vm0, %v315_v57, 0  ;;  %vm262_vm8 = vcmp.ge.f32.partialorder %v246_v43, 0.0  ;;  %v278_v2 = vmul.f32 0.2, %v246_v43  ;;  %v1637_v56 = vld [vmem:[%s2149_s1 + $0x18] sm:$0xff] }
  0x96   : > { %475 = vmatpush.bf16.msra.mxu2 %v369_v0  ;;  %504 = vmatpush.bf16.msra.mxu3 %v372_v1  ;;  %v375_v3 = vsel %vm361_vm0, %v316_v61, 0  ;;  %v293_v4 = vsel %vm261_vm7, %v245_v42, %v277_v62  ;;  %vm263_vm9 = vcmp.ge.f32.partialorder %v247_v44, 0.0  ;;  %v279_v5 = vmul.f32 0.2, %v247_v44 }
  0x97   : > { %v317_v6 = vpack.c.bf16 %v293_v4, %v293_v4  ;;  %v294_v7 = vsel %vm262_vm8, %v246_v43, %v278_v2  ;;  %v248_v8 = vadd.f32 %v1554_v32, %v226_v33  ;;  %v249_v9 = vadd.f32 %v1554_v32, %v227_v34 }
  0x98   : > { %v318_v10 = vpack.c.bf16 %v294_v7, %v294_v7  ;;  %v295_v11 = vsel %vm263_vm9, %v247_v44, %v279_v5  ;;  %1357 = vmatmul.msk.bf16.vlgmr.msra.gmra.mxu0 %vm348_vm1, %v1571_v63  ;;  %1361 = vmatmul.msk.bf16.vlgmr.msra.gmra.mxu1 %vm348_vm1, %v1571_v63  ;;  %v250_v12 = vadd.f32 %v1554_v32, %v228_v35 }
  0x99   : > { %533 = vmatpush.bf16.msrb.mxu0 %v375_v3  ;;  %v378_v13 = vsel %vm361_vm0, %v317_v6, 0  ;;  %v319_v14 = vpack.c.bf16 %v295_v11, %v295_v11  ;;  %1365 = vmatmul.msk.bf16.vlgmr.msra.gmra.mxu2 %vm348_vm1, %v1571_v63  ;;  %vm264_vm10 = vcmp.ge.f32.partialorder %v248_v8, 0.0  ;;  %v280_v15 = vmul.f32 0.2, %v248_v8 }
  0x9a   : > { %1369 = vmatmul.msk.bf16.vlgmr.msra.gmra.mxu3 %vm348_vm1, %v1571_v63  ;;  %562 = vmatpush.bf16.msrb.mxu1 %v378_v13  ;;  %v381_v16 = vsel %vm361_vm0, %v318_v10, 0  ;;  %vm265_vm11 = vcmp.ge.f32.partialorder %v249_v9, 0.0  ;;  %v281_v21 = vmul.f32 0.2, %v249_v9  ;;  %vm266_vm12 = vcmp.ge.f32.partialorder %v250_v12, 0.0 }
  0x9b   : > { %591 = vmatpush.bf16.msrb.mxu2 %v381_v16  ;;  %v384_v22 = vsel %vm361_vm0, %v319_v14, 0  ;;  %v296_v23 = vsel %vm264_vm10, %v248_v8, %v280_v15  ;;  %v282_v24 = vmul.f32 0.2, %v250_v12  ;;  %v251_v25 = vadd.f32 %v1554_v32, %v1556_v36 }
  0x9c   : > { %620 = vmatpush.bf16.msrb.mxu3 %v384_v22  ;;  %v320_v26 = vpack.c.bf16 %v296_v23, %v296_v23  ;;  %v297_v27 = vsel %vm265_vm11, %v249_v9, %v281_v21  ;;  %v252_v28 = vadd.f32 %v1554_v32, %v1546_v17  ;;  %v253_v29 = vadd.f32 %v1554_v32, %v1548_v18 }
  0x9d   : > { %v321_v30 = vpack.c.bf16 %v297_v27, %v297_v27  ;;  %v298_v31 = vsel %vm266_vm12, %v250_v12, %v282_v24  ;;  %vm267_vm13 = vcmp.ge.f32.partialorder %v251_v25, 0.0  ;;  %v283_v33 = vmul.f32 0.2, %v251_v25 }
  0x9e   : > { %v387_v34 = vsel %vm361_vm0, %v320_v26, 0  ;;  %v322_v35 = vpack.c.bf16 %v298_v31, %v298_v31  ;;  %vm268_vm14 = vcmp.ge.f32.partialorder %v252_v28, 0.0  ;;  %v284_v37 = vmul.f32 0.2, %v252_v28 }
  0x9f   : > { %649 = vmatpush.bf16.msra.mxu0 %v387_v34  ;;  %v390_v36 = vsel %vm361_vm0, %v321_v30, 0  ;;  %v299_v38 = vsel %vm267_vm13, %v251_v25, %v283_v33  ;;  %vm269_vm15 = vcmp.ge.f32.partialorder %v253_v29, 0.0  ;;  %v285_v39 = vmul.f32 0.2, %v253_v29 }
  0xa0   : > { %678 = vmatpush.bf16.msra.mxu1 %v390_v36  ;;  %v393_v17 = vsel %vm361_vm0, %v322_v35, 0  ;;  %v323_v40 = vpack.c.bf16 %v299_v38, %v299_v38  ;;  %v300_v18 = vsel %vm268_vm14, %v252_v28, %v284_v37  ;;  %v254_v41 = vadd.f32 %v1554_v32, %v1550_v19  ;;  %v1608_v19 = vld [vmem:[%s2149_s1 + $0x8] sm:$0xff] }
  0xa1   : > { %707 = vmatpush.bf16.msra.mxu2 %v393_v17  ;;  %v324_v42 = vpack.c.bf16 %v300_v18, %v300_v18  ;;  %v301_v43 = vsel %vm269_vm15, %v253_v29, %v285_v39  ;;  %v255_v44 = vadd.f32 %v1554_v32, %v1552_v20 }
  0xa2   : > { %v396_v45 = vsel %vm361_vm0, %v323_v40, 0  ;;  %v325_v46 = vpack.c.bf16 %v301_v43, %v301_v43  ;;  %vm270_vm2 = vcmp.ge.f32.partialorder %v254_v41, 0.0  ;;  %v286_v47 = vmul.f32 0.2, %v254_v41 }
  0xa3   : > { %736 = vmatpush.bf16.msra.mxu3 %v396_v45  ;;  %v399_v48 = vsel %vm361_vm0, %v324_v42, 0  ;;  %vm271_vm3 = vcmp.ge.f32.partialorder %v255_v44, 0.0  ;;  %v287_v49 = vmul.f32 0.2, %v255_v44 }
  0xa4   : > { %v402_v50 = vsel %vm361_vm0, %v325_v46, 0  ;;  %v302_v51 = vsel %vm270_vm2, %v254_v41, %v286_v47 }
  0xa5   : > { %v326_v52 = vpack.c.bf16 %v302_v51, %v302_v51  ;;  %v303_v20 = vsel %vm271_vm3, %v255_v44, %v287_v49 }
  0xa6   : > { %v327_v32 = vpack.c.bf16 %v303_v20, %v303_v20 }
  0xa7   : > { %v405_v53 = vsel %vm361_vm0, %v326_v52, 0 }
  0xa8   : > { %1358 = vmatmul.msk.bf16.gmra.mxu0 %vm348_vm1, %v1608_v19  ;;  %1362 = vmatmul.msk.bf16.gmra.mxu1 %vm348_vm1, %v1608_v19  ;;  %v408_v54 = vsel %vm361_vm0, %v327_v32, 0 }
  0xa9   : > { %1366 = vmatmul.msk.bf16.gmra.mxu2 %vm348_vm1, %v1608_v19 }
  0xaa   : > { %1370 = vmatmul.msk.bf16.gmra.mxu3 %vm348_vm1, %v1608_v19 }
  0xb8   : > { %1359 = vmatmul.msk.bf16.gmra.mxu0 %vm348_vm1, %v1624_v55  ;;  %1363 = vmatmul.msk.bf16.gmra.mxu1 %vm348_vm1, %v1624_v55 }
  0xb9   : > { %1367 = vmatmul.msk.bf16.gmra.mxu2 %vm348_vm1, %v1624_v55 }
  0xba   : > { %1371 = vmatmul.msk.bf16.gmra.mxu3 %vm348_vm1, %v1624_v55 }
  0xc8   : > { %1360 = vmatmul.msk.bf16.gmra.mxu0 %vm348_vm1, %v1637_v56  ;;  %1364 = vmatmul.msk.bf16.gmra.mxu1 %vm348_vm1, %v1637_v56 }
  0xc9   : > { %1368 = vmatmul.msk.bf16.gmra.mxu2 %vm348_vm1, %v1637_v56 }
  0xca   : > { %1372 = vmatmul.msk.bf16.gmra.mxu3 %vm348_vm1, %v1637_v56 }
  0xd8   : > { %1373 = vmatmul.msk.bf16.vlgmr.msrb.gmra.mxu0 %vm348_vm1, %v1571_v63  ;;  %1377 = vmatmul.msk.bf16.vlgmr.msrb.gmra.mxu1 %vm348_vm1, %v1571_v63 }
  0xd9   : > { %1381 = vmatmul.msk.bf16.vlgmr.msrb.gmra.mxu2 %vm348_vm1, %v1571_v63  ;;  %765 = vmatpush.bf16.msrb.mxu0 %v399_v48 }
  0xda   : > { %1385 = vmatmul.msk.bf16.vlgmr.msrb.gmra.mxu3 %vm348_vm1, %v1571_v63  ;;  %794 = vmatpush.bf16.msrb.mxu1 %v402_v50 }
  0xdb   : > { %823 = vmatpush.bf16.msrb.mxu2 %v405_v53  ;;  %852 = vmatpush.bf16.msrb.mxu3 %v408_v54 }
  0xe8   : > { %1374 = vmatmul.msk.bf16.gmra.mxu0 %vm348_vm1, %v1608_v19  ;;  %1378 = vmatmul.msk.bf16.gmra.mxu1 %vm348_vm1, %v1608_v19 }
  0xe9   : > { %1382 = vmatmul.msk.bf16.gmra.mxu2 %vm348_vm1, %v1608_v19 }
  0xea   : > { %1386 = vmatmul.msk.bf16.gmra.mxu3 %vm348_vm1, %v1608_v19 }
  0xf8   : > { %1375 = vmatmul.msk.bf16.gmra.mxu0 %vm348_vm1, %v1624_v55  ;;  %1379 = vmatmul.msk.bf16.gmra.mxu1 %vm348_vm1, %v1624_v55 }
  0xf9   : > { %1383 = vmatmul.msk.bf16.gmra.mxu2 %vm348_vm1, %v1624_v55 }
  0xfa   : > { %1387 = vmatmul.msk.bf16.gmra.mxu3 %vm348_vm1, %v1624_v55 }
 0x108   : > { %1376 = vmatmul.msk.bf16.gmra.mxu0 %vm348_vm1, %v1637_v56  ;;  %1380 = vmatmul.msk.bf16.gmra.mxu1 %vm348_vm1, %v1637_v56 }
 0x109   : > { %1384 = vmatmul.msk.bf16.gmra.mxu2 %vm348_vm1, %v1637_v56 }
 0x10a   : > { %1388 = vmatmul.msk.bf16.gmra.mxu3 %vm348_vm1, %v1637_v56 }
 0x115   : > { %v419_v57 = vpop.f32.mrf.mxu0  ;;  %v448_v58 = vpop.f32.mrf.mxu1 }
 0x116   : > { %874 = vst [vmem:[%s1680_s21] sm:$0xff] %v419_v57 }
 0x117   : > { %875 = vst [vmem:[%s1680_s21 + $0x8] sm:$0xff] %v448_v58 }
 0x118   : > { %1389 = vmatmul.msk.bf16.vlgmr.msra.gmra.mxu0 %vm348_vm1, %v1571_v63  ;;  %1393 = vmatmul.msk.bf16.vlgmr.msra.gmra.mxu1 %vm348_vm1, %v1571_v63 }
 0x119   : > { %1397 = vmatmul.msk.bf16.vlgmr.msra.gmra.mxu2 %vm348_vm1, %v1571_v63 }
 0x11a   : > { %1401 = vmatmul.msk.bf16.vlgmr.msra.gmra.mxu3 %vm348_vm1, %v1571_v63 }
 0x11c   : > { %v477_v59 = vpop.f32.mrf.mxu2 }
 0x11d   : > { %v506_v60 = vpop.f32.mrf.mxu3  ;;  %876 = vst [vmem:[%s1680_s21 + $0x10] sm:$0xff] %v477_v59  ;;  %v421_v61 = vpop.f32.mrf.mxu0 }
 0x11e   : > { %v450_v62 = vpop.f32.mrf.mxu1  ;;  %877 = vst [vmem:[%s1680_s21 + $0x18] sm:$0xff] %v506_v60 }
 0x11f   : > { %890 = vst [vmem:[%s1680_s21 + $0x80] sm:$0xff] %v421_v61 }
 0x120   : > { %891 = vst [vmem:[%s1680_s21 + $0x88] sm:$0xff] %v450_v62 }
 0x124   : > { %v479_v0 = vpop.f32.mrf.mxu2 }
 0x125   : > { %v508_v1 = vpop.f32.mrf.mxu3  ;;  %892 = vst [vmem:[%s1680_s21 + $0x90] sm:$0xff] %v479_v0  ;;  %v424_v2 = vpop.f32.mrf.mxu0 }
 0x126   : > { %v453_v3 = vpop.f32.mrf.mxu1  ;;  %893 = vst [vmem:[%s1680_s21 + $0x98] sm:$0xff] %v508_v1 }
 0x127   : > { %906 = vst [vmem:[%s1680_s21 + $0x100] sm:$0xff] %v424_v2 }
 0x128   : > { %907 = vst [vmem:[%s1680_s21 + $0x108] sm:$0xff] %v453_v3  ;;  %1390 = vmatmul.msk.bf16.gmra.mxu0 %vm348_vm1, %v1608_v19  ;;  %1394 = vmatmul.msk.bf16.gmra.mxu1 %vm348_vm1, %v1608_v19 }
 0x129   : > { %1398 = vmatmul.msk.bf16.gmra.mxu2 %vm348_vm1, %v1608_v19 }
 0x12a   : > { %1402 = vmatmul.msk.bf16.gmra.mxu3 %vm348_vm1, %v1608_v19 }
 0x12c   : > { %v482_v4 = vpop.f32.mrf.mxu2 }
 0x12d   : > { %v511_v5 = vpop.f32.mrf.mxu3  ;;  %908 = vst [vmem:[%s1680_s21 + $0x110] sm:$0xff] %v482_v4  ;;  %v426_v6 = vpop.f32.mrf.mxu0 }
 0x12e   : > { %v455_v7 = vpop.f32.mrf.mxu1  ;;  %909 = vst [vmem:[%s1680_s21 + $0x118] sm:$0xff] %v511_v5 }
 0x12f   : > { %922 = vst [vmem:[%s1680_s21 + $0x180] sm:$0xff] %v426_v6 }
 0x130   : > { %923 = vst [vmem:[%s1680_s21 + $0x188] sm:$0xff] %v455_v7 }
 0x134   : > { %v484_v8 = vpop.f32.mrf.mxu2 }
 0x135   : > { %v513_v9 = vpop.f32.mrf.mxu3  ;;  %924 = vst [vmem:[%s1680_s21 + $0x190] sm:$0xff] %v484_v8  ;;  %v429_v10 = vpop.f32.mrf.mxu0 }
 0x136   : > { %v458_v11 = vpop.f32.mrf.mxu1  ;;  %925 = vst [vmem:[%s1680_s21 + $0x198] sm:$0xff] %v513_v9 }
 0x137   : > { %938 = vst [vmem:[%s1680_s21 + $0x200] sm:$0xff] %v429_v10 }
 0x138   : > { %939 = vst [vmem:[%s1680_s21 + $0x208] sm:$0xff] %v458_v11  ;;  %1391 = vmatmul.msk.bf16.gmra.mxu0 %vm348_vm1, %v1624_v55  ;;  %1395 = vmatmul.msk.bf16.gmra.mxu1 %vm348_vm1, %v1624_v55 }
 0x139   : > { %1399 = vmatmul.msk.bf16.gmra.mxu2 %vm348_vm1, %v1624_v55 }
 0x13a   : > { %1403 = vmatmul.msk.bf16.gmra.mxu3 %vm348_vm1, %v1624_v55 }
 0x13c   : > { %v487_v12 = vpop.f32.mrf.mxu2 }
 0x13d   : > { %v516_v13 = vpop.f32.mrf.mxu3  ;;  %940 = vst [vmem:[%s1680_s21 + $0x210] sm:$0xff] %v487_v12  ;;  %v431_v14 = vpop.f32.mrf.mxu0 }
 0x13e   : > { %v460_v15 = vpop.f32.mrf.mxu1  ;;  %941 = vst [vmem:[%s1680_s21 + $0x218] sm:$0xff] %v516_v13 }
 0x13f   : > { %954 = vst [vmem:[%s1680_s21 + $0x280] sm:$0xff] %v431_v14 }
 0x140   : > { %955 = vst [vmem:[%s1680_s21 + $0x288] sm:$0xff] %v460_v15 }
 0x144   : > { %v489_v16 = vpop.f32.mrf.mxu2 }
 0x145   : > { %v518_v21 = vpop.f32.mrf.mxu3  ;;  %956 = vst [vmem:[%s1680_s21 + $0x290] sm:$0xff] %v489_v16  ;;  %v434_v22 = vpop.f32.mrf.mxu0 }
 0x146   : > { %v463_v23 = vpop.f32.mrf.mxu1  ;;  %957 = vst [vmem:[%s1680_s21 + $0x298] sm:$0xff] %v518_v21 }
 0x147   : > { %970 = vst [vmem:[%s1680_s21 + $0x300] sm:$0xff] %v434_v22 }
 0x148   : > { %971 = vst [vmem:[%s1680_s21 + $0x308] sm:$0xff] %v463_v23  ;;  %1392 = vmatmul.msk.bf16.gmra.mxu0 %vm348_vm1, %v1637_v56  ;;  %1396 = vmatmul.msk.bf16.gmra.mxu1 %vm348_vm1, %v1637_v56 }
 0x149   : > { %1400 = vmatmul.msk.bf16.gmra.mxu2 %vm348_vm1, %v1637_v56 }
 0x14a   : > { %1404 = vmatmul.msk.bf16.gmra.mxu3 %vm348_vm1, %v1637_v56 }
 0x14c   : > { %v492_v24 = vpop.f32.mrf.mxu2 }
 0x14d   : > { %v521_v25 = vpop.f32.mrf.mxu3  ;;  %972 = vst [vmem:[%s1680_s21 + $0x310] sm:$0xff] %v492_v24  ;;  %v436_v26 = vpop.f32.mrf.mxu0 }
 0x14e   : > { %v465_v27 = vpop.f32.mrf.mxu1  ;;  %973 = vst [vmem:[%s1680_s21 + $0x318] sm:$0xff] %v521_v25 }
 0x14f   : > { %986 = vst [vmem:[%s1680_s21 + $0x380] sm:$0xff] %v436_v26 }
 0x150   : > { %987 = vst [vmem:[%s1680_s21 + $0x388] sm:$0xff] %v465_v27 }
 0x154   : > { %v494_v28 = vpop.f32.mrf.mxu2 }
 0x155   : > { %v523_v29 = vpop.f32.mrf.mxu3  ;;  %988 = vst [vmem:[%s1680_s21 + $0x390] sm:$0xff] %v494_v28  ;;  %v535_v30 = vpop.f32.mrf.mxu0 }
 0x156   : > { %v564_v31 = vpop.f32.mrf.mxu1  ;;  %989 = vst [vmem:[%s1680_s21 + $0x398] sm:$0xff] %v523_v29 }
 0x157   : > { %878 = vst [vmem:[%s1680_s21 + $0x20] sm:$0xff] %v535_v30 }
 0x158   : > { %879 = vst [vmem:[%s1680_s21 + $0x28] sm:$0xff] %v564_v31  ;;  %1405 = vmatmul.msk.bf16.vlgmr.msrb.gmra.mxu0 %vm348_vm1, %v1571_v63  ;;  %1409 = vmatmul.msk.bf16.vlgmr.msrb.gmra.mxu1 %vm348_vm1, %v1571_v63 }
 0x159   : > { %1413 = vmatmul.msk.bf16.vlgmr.msrb.gmra.mxu2 %vm348_vm1, %v1571_v63 }
 0x15a   : > { %1417 = vmatmul.msk.bf16.vlgmr.msrb.gmra.mxu3 %vm348_vm1, %v1571_v63 }
 0x15c   : > { %v593_v33 = vpop.f32.mrf.mxu2 }
 0x15d   : > { %v622_v34 = vpop.f32.mrf.mxu3  ;;  %880 = vst [vmem:[%s1680_s21 + $0x30] sm:$0xff] %v593_v33  ;;  %v537_v35 = vpop.f32.mrf.mxu0 }
 0x15e   : > { %v566_v37 = vpop.f32.mrf.mxu1  ;;  %881 = vst [vmem:[%s1680_s21 + $0x38] sm:$0xff] %v622_v34 }
 0x15f   : > { %894 = vst [vmem:[%s1680_s21 + $0xa0] sm:$0xff] %v537_v35 }
 0x160   : > { %895 = vst [vmem:[%s1680_s21 + $0xa8] sm:$0xff] %v566_v37 }
 0x164   : > { %v595_v36 = vpop.f32.mrf.mxu2 }
 0x165   : > { %v624_v38 = vpop.f32.mrf.mxu3  ;;  %896 = vst [vmem:[%s1680_s21 + $0xb0] sm:$0xff] %v595_v36  ;;  %v540_v39 = vpop.f32.mrf.mxu0 }
 0x166   : > { %v569_v17 = vpop.f32.mrf.mxu1  ;;  %897 = vst [vmem:[%s1680_s21 + $0xb8] sm:$0xff] %v624_v38 }
 0x167   : > { %910 = vst [vmem:[%s1680_s21 + $0x120] sm:$0xff] %v540_v39 }
 0x168   : > { %911 = vst [vmem:[%s1680_s21 + $0x128] sm:$0xff] %v569_v17  ;;  %1406 = vmatmul.msk.bf16.gmra.mxu0 %vm348_vm1, %v1608_v19  ;;  %1410 = vmatmul.msk.bf16.gmra.mxu1 %vm348_vm1, %v1608_v19 }
 0x169   : > { %1414 = vmatmul.msk.bf16.gmra.mxu2 %vm348_vm1, %v1608_v19 }
 0x16a   : > { %1418 = vmatmul.msk.bf16.gmra.mxu3 %vm348_vm1, %v1608_v19 }
 0x16c   : > { %v598_v63 = vpop.f32.mrf.mxu2 }
 0x16d   : > { %v627_v40 = vpop.f32.mrf.mxu3  ;;  %912 = vst [vmem:[%s1680_s21 + $0x130] sm:$0xff] %v598_v63  ;;  %v542_v18 = vpop.f32.mrf.mxu0 }
 0x16e   : > { %v571_v41 = vpop.f32.mrf.mxu1  ;;  %913 = vst [vmem:[%s1680_s21 + $0x138] sm:$0xff] %v627_v40 }
 0x16f   : > { %926 = vst [vmem:[%s1680_s21 + $0x1a0] sm:$0xff] %v542_v18 }
 0x170   : > { %927 = vst [vmem:[%s1680_s21 + $0x1a8] sm:$0xff] %v571_v41 }
 0x174   : > { %v600_v42 = vpop.f32.mrf.mxu2 }
 0x175   : > { %v629_v43 = vpop.f32.mrf.mxu3  ;;  %928 = vst [vmem:[%s1680_s21 + $0x1b0] sm:$0xff] %v600_v42  ;;  %v545_v44 = vpop.f32.mrf.mxu0 }
 0x176   : > { %v574_v45 = vpop.f32.mrf.mxu1  ;;  %929 = vst [vmem:[%s1680_s21 + $0x1b8] sm:$0xff] %v629_v43 }
 0x177   : > { %942 = vst [vmem:[%s1680_s21 + $0x220] sm:$0xff] %v545_v44 }
 0x178   : > { %943 = vst [vmem:[%s1680_s21 + $0x228] sm:$0xff] %v574_v45  ;;  %1407 = vmatmul.msk.bf16.gmra.mxu0 %vm348_vm1, %v1624_v55  ;;  %1411 = vmatmul.msk.bf16.gmra.mxu1 %vm348_vm1, %v1624_v55 }
 0x179   : > { %1415 = vmatmul.msk.bf16.gmra.mxu2 %vm348_vm1, %v1624_v55 }
 0x17a   : > { %1419 = vmatmul.msk.bf16.gmra.mxu3 %vm348_vm1, %v1624_v55 }
 0x17c   : > { %v603_v46 = vpop.f32.mrf.mxu2 }
 0x17d   : > { %v632_v47 = vpop.f32.mrf.mxu3  ;;  %944 = vst [vmem:[%s1680_s21 + $0x230] sm:$0xff] %v603_v46  ;;  %v547_v48 = vpop.f32.mrf.mxu0 }
 0x17e   : > { %v576_v49 = vpop.f32.mrf.mxu1  ;;  %945 = vst [vmem:[%s1680_s21 + $0x238] sm:$0xff] %v632_v47 }
 0x17f   : > { %958 = vst [vmem:[%s1680_s21 + $0x2a0] sm:$0xff] %v547_v48 }
 0x180   : > { %959 = vst [vmem:[%s1680_s21 + $0x2a8] sm:$0xff] %v576_v49 }
 0x184   : > { %v605_v19 = vpop.f32.mrf.mxu2 }
 0x185   : > { %v634_v50 = vpop.f32.mrf.mxu3  ;;  %960 = vst [vmem:[%s1680_s21 + $0x2b0] sm:$0xff] %v605_v19  ;;  %v550_v51 = vpop.f32.mrf.mxu0 }
 0x186   : > { %v579_v52 = vpop.f32.mrf.mxu1  ;;  %961 = vst [vmem:[%s1680_s21 + $0x2b8] sm:$0xff] %v634_v50 }
 0x187   : > { %974 = vst [vmem:[%s1680_s21 + $0x320] sm:$0xff] %v550_v51 }
 0x188   : > { %975 = vst [vmem:[%s1680_s21 + $0x328] sm:$0xff] %v579_v52  ;;  %1408 = vmatmul.msk.bf16.gmra.mxu0 %vm348_vm1, %v1637_v56  ;;  %1412 = vmatmul.msk.bf16.gmra.mxu1 %vm348_vm1, %v1637_v56 }
 0x189   : > { %1416 = vmatmul.msk.bf16.gmra.mxu2 %vm348_vm1, %v1637_v56 }
 0x18a   : > { %1420 = vmatmul.msk.bf16.gmra.mxu3 %vm348_vm1, %v1637_v56 }
 0x18c   : > { %v608_v20 = vpop.f32.mrf.mxu2 }
 0x18d   : > { %v637_v32 = vpop.f32.mrf.mxu3  ;;  %976 = vst [vmem:[%s1680_s21 + $0x330] sm:$0xff] %v608_v20  ;;  %v552_v53 = vpop.f32.mrf.mxu0 }
 0x18e   : > { %v581_v54 = vpop.f32.mrf.mxu1  ;;  %977 = vst [vmem:[%s1680_s21 + $0x338] sm:$0xff] %v637_v32 }
 0x18f   : > { %990 = vst [vmem:[%s1680_s21 + $0x3a0] sm:$0xff] %v552_v53 }
 0x190   : > { %991 = vst [vmem:[%s1680_s21 + $0x3a8] sm:$0xff] %v581_v54 }
 0x194   : > { %v610_v55 = vpop.f32.mrf.mxu2 }
 0x195   : > { %v639_v57 = vpop.f32.mrf.mxu3  ;;  %992 = vst [vmem:[%s1680_s21 + $0x3b0] sm:$0xff] %v610_v55  ;;  %v651_v58 = vpop.f32.mrf.mxu0 }
 0x196   : > { %v680_v59 = vpop.f32.mrf.mxu1  ;;  %993 = vst [vmem:[%s1680_s21 + $0x3b8] sm:$0xff] %v639_v57 }
 0x197   : > { %882 = vst [vmem:[%s1680_s21 + $0x40] sm:$0xff] %v651_v58  ;;  %v1024_v58 = vld [vmem:[%s1680_s21] sm:$0xff] (%p1532_p4) }
 0x198   : > { %883 = vst [vmem:[%s1680_s21 + $0x48] sm:$0xff] %v680_v59  ;;  %v1026_v59 = vld [vmem:[%s1680_s21 + $0x8] sm:$0xff] (%p1532_p4) }
 0x199   : > { %1025 = vst [vmem:[%s1882_s26] sm:$0xff] (%p1532_p4), %v1024_v58  ;;  %v1152_v58 = vld [vmem:[%s1680_s21 + $0x200] sm:$0xff] (%p1532_p4) }
 0x19a   : > { %1027 = vst [vmem:[%s1882_s26 + $0x8] sm:$0xff] (%p1532_p4), %v1026_v59  ;;  %v1154_v59 = vld [vmem:[%s1680_s21 + $0x208] sm:$0xff] (%p1532_p4) }
 0x19b   : > { %1153 = vst [vmem:[%s1882_s26 + $0x800] sm:$0xff] (%p1532_p4), %v1152_v58 }
 0x19c   : > { %v709_v56 = vpop.f32.mrf.mxu2  ;;  %1155 = vst [vmem:[%s1882_s26 + $0x808] sm:$0xff] (%p1532_p4), %v1154_v59 }
 0x19d   : > { %v738_v60 = vpop.f32.mrf.mxu3  ;;  %884 = vst [vmem:[%s1680_s21 + $0x50] sm:$0xff] %v709_v56  ;;  %v653_v61 = vpop.f32.mrf.mxu0  ;;  %v1028_v56 = vld [vmem:[%s1680_s21 + $0x10] sm:$0xff] (%p1532_p4) }
 0x19e   : > { %v682_v62 = vpop.f32.mrf.mxu1  ;;  %885 = vst [vmem:[%s1680_s21 + $0x58] sm:$0xff] %v738_v60  ;;  %v1030_v60 = vld [vmem:[%s1680_s21 + $0x18] sm:$0xff] (%p1532_p4) }
 0x19f   : > { %898 = vst [vmem:[%s1680_s21 + $0xc0] sm:$0xff] %v653_v61  ;;  %v1032_v61 = vld [vmem:[%s1680_s21 + $0x20] sm:$0xff] (%p1532_p4) }
 0x1a0   : > { %899 = vst [vmem:[%s1680_s21 + $0xc8] sm:$0xff] %v682_v62  ;;  %v1034_v62 = vld [vmem:[%s1680_s21 + $0x28] sm:$0xff] (%p1532_p4) }
 0x1a1   : > { %1029 = vst [vmem:[%s1882_s26 + $0x10] sm:$0xff] (%p1532_p4), %v1028_v56  ;;  %v1156_v56 = vld [vmem:[%s1680_s21 + $0x210] sm:$0xff] (%p1532_p4) }
 0x1a2   : > { %1031 = vst [vmem:[%s1882_s26 + $0x18] sm:$0xff] (%p1532_p4), %v1030_v60  ;;  %v1158_v60 = vld [vmem:[%s1680_s21 + $0x218] sm:$0xff] (%p1532_p4) }
 0x1a3   : > { %1033 = vst [vmem:[%s1882_s26 + $0x20] sm:$0xff] (%p1532_p4), %v1032_v61  ;;  %v1160_v61 = vld [vmem:[%s1680_s21 + $0x220] sm:$0xff] (%p1532_p4) }
 0x1a4   : > { %v711_v0 = vpop.f32.mrf.mxu2  ;;  %1035 = vst [vmem:[%s1882_s26 + $0x28] sm:$0xff] (%p1532_p4), %v1034_v62  ;;  %v1162_v62 = vld [vmem:[%s1680_s21 + $0x228] sm:$0xff] (%p1532_p4) }
 0x1a5   : > { %v740_v1 = vpop.f32.mrf.mxu3  ;;  %900 = vst [vmem:[%s1680_s21 + $0xd0] sm:$0xff] %v711_v0  ;;  %v656_v2 = vpop.f32.mrf.mxu0  ;;  %v1036_v0 = vld [vmem:[%s1680_s21 + $0x30] sm:$0xff] (%p1532_p4) }
 0x1a6   : > { %v685_v3 = vpop.f32.mrf.mxu1  ;;  %901 = vst [vmem:[%s1680_s21 + $0xd8] sm:$0xff] %v740_v1  ;;  %v1038_v1 = vld [vmem:[%s1680_s21 + $0x38] sm:$0xff] (%p1532_p4) }
 0x1a7   : > { %914 = vst [vmem:[%s1680_s21 + $0x140] sm:$0xff] %v656_v2  ;;  %v1040_v2 = vld [vmem:[%s1680_s21 + $0x40] sm:$0xff] (%p1532_p4) }
 0x1a8   : > { %915 = vst [vmem:[%s1680_s21 + $0x148] sm:$0xff] %v685_v3  ;;  %v1042_v3 = vld [vmem:[%s1680_s21 + $0x48] sm:$0xff] (%p1532_p4) }
 0x1a9   : > { %1037 = vst [vmem:[%s1882_s26 + $0x30] sm:$0xff] (%p1532_p4), %v1036_v0  ;;  %v1164_v0 = vld [vmem:[%s1680_s21 + $0x230] sm:$0xff] (%p1532_p4) }
 0x1aa   : > { %1039 = vst [vmem:[%s1882_s26 + $0x38] sm:$0xff] (%p1532_p4), %v1038_v1  ;;  %v1166_v1 = vld [vmem:[%s1680_s21 + $0x238] sm:$0xff] (%p1532_p4) }
 0x1ab   : > { %1041 = vst [vmem:[%s1882_s26 + $0x40] sm:$0xff] (%p1532_p4), %v1040_v2 }
 0x1ac   : > { %v714_v4 = vpop.f32.mrf.mxu2  ;;  %1043 = vst [vmem:[%s1882_s26 + $0x48] sm:$0xff] (%p1532_p4), %v1042_v3 }
 0x1ad   : > { %v743_v5 = vpop.f32.mrf.mxu3  ;;  %916 = vst [vmem:[%s1680_s21 + $0x150] sm:$0xff] %v714_v4  ;;  %v658_v6 = vpop.f32.mrf.mxu0  ;;  %v1044_v4 = vld [vmem:[%s1680_s21 + $0x50] sm:$0xff] (%p1532_p4) }
 0x1ae   : > { %v687_v7 = vpop.f32.mrf.mxu1  ;;  %917 = vst [vmem:[%s1680_s21 + $0x158] sm:$0xff] %v743_v5  ;;  %v1046_v5 = vld [vmem:[%s1680_s21 + $0x58] sm:$0xff] (%p1532_p4) }
 0x1af   : > { %930 = vst [vmem:[%s1680_s21 + $0x1c0] sm:$0xff] %v658_v6 }
 0x1b0   : > { %931 = vst [vmem:[%s1680_s21 + $0x1c8] sm:$0xff] %v687_v7 }
 0x1b1   : > { %1045 = vst [vmem:[%s1882_s26 + $0x50] sm:$0xff] (%p1532_p4), %v1044_v4 }
 0x1b2   : > { %1047 = vst [vmem:[%s1882_s26 + $0x58] sm:$0xff] (%p1532_p4), %v1046_v5 }
 0x1b3   : > { %1157 = vst [vmem:[%s1882_s26 + $0x810] sm:$0xff] (%p1532_p4), %v1156_v56 }
 0x1b4   : > { %v716_v8 = vpop.f32.mrf.mxu2  ;;  %1159 = vst [vmem:[%s1882_s26 + $0x818] sm:$0xff] (%p1532_p4), %v1158_v60 }
 0x1b5   : > { %v745_v9 = vpop.f32.mrf.mxu3  ;;  %932 = vst [vmem:[%s1680_s21 + $0x1d0] sm:$0xff] %v716_v8  ;;  %v661_v10 = vpop.f32.mrf.mxu0 }
 0x1b6   : > { %v690_v11 = vpop.f32.mrf.mxu1  ;;  %933 = vst [vmem:[%s1680_s21 + $0x1d8] sm:$0xff] %v745_v9 }
 0x1b7   : > { %946 = vst [vmem:[%s1680_s21 + $0x240] sm:$0xff] %v661_v10  ;;  %v1056_v10 = vld [vmem:[%s1680_s21 + $0x80] sm:$0xff] (%p1532_p4) }
 0x1b8   : > { %947 = vst [vmem:[%s1680_s21 + $0x248] sm:$0xff] %v690_v11  ;;  %v1058_v11 = vld [vmem:[%s1680_s21 + $0x88] sm:$0xff] (%p1532_p4) }
 0x1b9   : > { %1057 = vst [vmem:[%s1882_s26 + $0x200] sm:$0xff] (%p1532_p4), %v1056_v10  ;;  %v1184_v10 = vld [vmem:[%s1680_s21 + $0x280] sm:$0xff] (%p1532_p4) }
 0x1ba   : > { %1059 = vst [vmem:[%s1882_s26 + $0x208] sm:$0xff] (%p1532_p4), %v1058_v11  ;;  %v1186_v11 = vld [vmem:[%s1680_s21 + $0x288] sm:$0xff] (%p1532_p4) }
 0x1bb   : > { %1161 = vst [vmem:[%s1882_s26 + $0x820] sm:$0xff] (%p1532_p4), %v1160_v61 }
 0x1bc   : > { %v719_v12 = vpop.f32.mrf.mxu2  ;;  %1163 = vst [vmem:[%s1882_s26 + $0x828] sm:$0xff] (%p1532_p4), %v1162_v62 }
 0x1bd   : > { %v748_v13 = vpop.f32.mrf.mxu3  ;;  %948 = vst [vmem:[%s1680_s21 + $0x250] sm:$0xff] %v719_v12  ;;  %v663_v14 = vpop.f32.mrf.mxu0  ;;  %v1060_v12 = vld [vmem:[%s1680_s21 + $0x90] sm:$0xff] (%p1532_p4) }
 0x1be   : > { %v692_v15 = vpop.f32.mrf.mxu1  ;;  %949 = vst [vmem:[%s1680_s21 + $0x258] sm:$0xff] %v748_v13  ;;  %v1062_v13 = vld [vmem:[%s1680_s21 + $0x98] sm:$0xff] (%p1532_p4)  ;;  %v1168_v2 = vld [vmem:[%s1680_s21 + $0x240] sm:$0xff] (%p1532_p4) }
 0x1bf   : > { %962 = vst [vmem:[%s1680_s21 + $0x2c0] sm:$0xff] %v663_v14  ;;  %v1064_v14 = vld [vmem:[%s1680_s21 + $0xa0] sm:$0xff] (%p1532_p4)  ;;  %v1170_v3 = vld [vmem:[%s1680_s21 + $0x248] sm:$0xff] (%p1532_p4) }
 0x1c0   : > { %963 = vst [vmem:[%s1680_s21 + $0x2c8] sm:$0xff] %v692_v15  ;;  %v1066_v15 = vld [vmem:[%s1680_s21 + $0xa8] sm:$0xff] (%p1532_p4) }
 0x1c1   : > { %1061 = vst [vmem:[%s1882_s26 + $0x210] sm:$0xff] (%p1532_p4), %v1060_v12  ;;  %v1188_v12 = vld [vmem:[%s1680_s21 + $0x290] sm:$0xff] (%p1532_p4) }
 0x1c2   : > { %1063 = vst [vmem:[%s1882_s26 + $0x218] sm:$0xff] (%p1532_p4), %v1062_v13  ;;  %v1190_v13 = vld [vmem:[%s1680_s21 + $0x298] sm:$0xff] (%p1532_p4) }
 0x1c3   : > { %1065 = vst [vmem:[%s1882_s26 + $0x220] sm:$0xff] (%p1532_p4), %v1064_v14  ;;  %v1192_v14 = vld [vmem:[%s1680_s21 + $0x2a0] sm:$0xff] (%p1532_p4) }
 0x1c4   : > { %v721_v16 = vpop.f32.mrf.mxu2  ;;  %1067 = vst [vmem:[%s1882_s26 + $0x228] sm:$0xff] (%p1532_p4), %v1066_v15  ;;  %v1172_v4 = vld [vmem:[%s1680_s21 + $0x250] sm:$0xff] (%p1532_p4)  ;;  %v1194_v15 = vld [vmem:[%s1680_s21 + $0x2a8] sm:$0xff] (%p1532_p4) }
 0x1c5   : > { %v750_v21 = vpop.f32.mrf.mxu3  ;;  %964 = vst [vmem:[%s1680_s21 + $0x2d0] sm:$0xff] %v721_v16  ;;  %v666_v22 = vpop.f32.mrf.mxu0  ;;  %v1068_v16 = vld [vmem:[%s1680_s21 + $0xb0] sm:$0xff] (%p1532_p4)  ;;  %v1174_v5 = vld [vmem:[%s1680_s21 + $0x258] sm:$0xff] (%p1532_p4) }
 0x1c6   : > { %v695_v23 = vpop.f32.mrf.mxu1  ;;  %965 = vst [vmem:[%s1680_s21 + $0x2d8] sm:$0xff] %v750_v21  ;;  %v1070_v21 = vld [vmem:[%s1680_s21 + $0xb8] sm:$0xff] (%p1532_p4) }
 0x1c7   : > { %978 = vst [vmem:[%s1680_s21 + $0x340] sm:$0xff] %v666_v22  ;;  %v1072_v22 = vld [vmem:[%s1680_s21 + $0xc0] sm:$0xff] (%p1532_p4) }
 0x1c8   : > { %979 = vst [vmem:[%s1680_s21 + $0x348] sm:$0xff] %v695_v23  ;;  %v1074_v23 = vld [vmem:[%s1680_s21 + $0xc8] sm:$0xff] (%p1532_p4) }
 0x1c9   : > { %1069 = vst [vmem:[%s1882_s26 + $0x230] sm:$0xff] (%p1532_p4), %v1068_v16  ;;  %v1196_v16 = vld [vmem:[%s1680_s21 + $0x2b0] sm:$0xff] (%p1532_p4) }
 0x1ca   : > { %1071 = vst [vmem:[%s1882_s26 + $0x238] sm:$0xff] (%p1532_p4), %v1070_v21  ;;  %v1198_v21 = vld [vmem:[%s1680_s21 + $0x2b8] sm:$0xff] (%p1532_p4) }
 0x1cb   : > { %1073 = vst [vmem:[%s1882_s26 + $0x240] sm:$0xff] (%p1532_p4), %v1072_v22  ;;  %v1200_v22 = vld [vmem:[%s1680_s21 + $0x2c0] sm:$0xff] (%p1532_p4) }
 0x1cc   : > { %v724_v24 = vpop.f32.mrf.mxu2  ;;  %1075 = vst [vmem:[%s1882_s26 + $0x248] sm:$0xff] (%p1532_p4), %v1074_v23  ;;  %v1202_v23 = vld [vmem:[%s1680_s21 + $0x2c8] sm:$0xff] (%p1532_p4) }
 0x1cd   : > { %v753_v25 = vpop.f32.mrf.mxu3  ;;  %980 = vst [vmem:[%s1680_s21 + $0x350] sm:$0xff] %v724_v24  ;;  %v668_v26 = vpop.f32.mrf.mxu0  ;;  %v1076_v24 = vld [vmem:[%s1680_s21 + $0xd0] sm:$0xff] (%p1532_p4) }
 0x1ce   : > { %v697_v27 = vpop.f32.mrf.mxu1  ;;  %981 = vst [vmem:[%s1680_s21 + $0x358] sm:$0xff] %v753_v25  ;;  %v1078_v25 = vld [vmem:[%s1680_s21 + $0xd8] sm:$0xff] (%p1532_p4) }
 0x1cf   : > { %994 = vst [vmem:[%s1680_s21 + $0x3c0] sm:$0xff] %v668_v26 }
 0x1d0   : > { %995 = vst [vmem:[%s1680_s21 + $0x3c8] sm:$0xff] %v697_v27 }
 0x1d1   : > { %1077 = vst [vmem:[%s1882_s26 + $0x250] sm:$0xff] (%p1532_p4), %v1076_v24  ;;  %v1204_v24 = vld [vmem:[%s1680_s21 + $0x2d0] sm:$0xff] (%p1532_p4) }
 0x1d2   : > { %1079 = vst [vmem:[%s1882_s26 + $0x258] sm:$0xff] (%p1532_p4), %v1078_v25  ;;  %v1206_v25 = vld [vmem:[%s1680_s21 + $0x2d8] sm:$0xff] (%p1532_p4) }
 0x1d3   : > { %1165 = vst [vmem:[%s1882_s26 + $0x830] sm:$0xff] (%p1532_p4), %v1164_v0 }
 0x1d4   : > { %v726_v28 = vpop.f32.mrf.mxu2  ;;  %1167 = vst [vmem:[%s1882_s26 + $0x838] sm:$0xff] (%p1532_p4), %v1166_v1 }
 0x1d5   : > { %v755_v29 = vpop.f32.mrf.mxu3  ;;  %996 = vst [vmem:[%s1680_s21 + $0x3d0] sm:$0xff] %v726_v28  ;;  %v767_v30 = vpop.f32.mrf.mxu0 }
 0x1d6   : > { %v796_v31 = vpop.f32.mrf.mxu1  ;;  %997 = vst [vmem:[%s1680_s21 + $0x3d8] sm:$0xff] %v755_v29 }
 0x1d7   : > { %886 = vst [vmem:[%s1680_s21 + $0x60] sm:$0xff] %v767_v30  ;;  %v1088_v30 = vld [vmem:[%s1680_s21 + $0x100] sm:$0xff] (%p1532_p4) }
 0x1d8   : > { %887 = vst [vmem:[%s1680_s21 + $0x68] sm:$0xff] %v796_v31  ;;  %v1090_v31 = vld [vmem:[%s1680_s21 + $0x108] sm:$0xff] (%p1532_p4) }
 0x1d9   : > { %1089 = vst [vmem:[%s1882_s26 + $0x400] sm:$0xff] (%p1532_p4), %v1088_v30  ;;  %v1216_v30 = vld [vmem:[%s1680_s21 + $0x300] sm:$0xff] (%p1532_p4) }
 0x1da   : > { %1091 = vst [vmem:[%s1882_s26 + $0x408] sm:$0xff] (%p1532_p4), %v1090_v31  ;;  %v1218_v31 = vld [vmem:[%s1680_s21 + $0x308] sm:$0xff] (%p1532_p4) }
 0x1db   : > { %1169 = vst [vmem:[%s1882_s26 + $0x840] sm:$0xff] (%p1532_p4), %v1168_v2 }
 0x1dc   : > { %v825_v33 = vpop.f32.mrf.mxu2  ;;  %1171 = vst [vmem:[%s1882_s26 + $0x848] sm:$0xff] (%p1532_p4), %v1170_v3 }
 0x1dd   : > { %v854_v34 = vpop.f32.mrf.mxu3  ;;  %888 = vst [vmem:[%s1680_s21 + $0x70] sm:$0xff] %v825_v33  ;;  %v769_v35 = vpop.f32.mrf.mxu0  ;;  %v1092_v33 = vld [vmem:[%s1680_s21 + $0x110] sm:$0xff] (%p1532_p4) }
 0x1de   : > { %v798_v37 = vpop.f32.mrf.mxu1  ;;  %889 = vst [vmem:[%s1680_s21 + $0x78] sm:$0xff] %v854_v34  ;;  %v1048_v6 = vld [vmem:[%s1680_s21 + $0x60] sm:$0xff] (%p1532_p4)  ;;  %v1094_v34 = vld [vmem:[%s1680_s21 + $0x118] sm:$0xff] (%p1532_p4) }
 0x1df   : > { %902 = vst [vmem:[%s1680_s21 + $0xe0] sm:$0xff] %v769_v35  ;;  %v1050_v7 = vld [vmem:[%s1680_s21 + $0x68] sm:$0xff] (%p1532_p4)  ;;  %v1096_v35 = vld [vmem:[%s1680_s21 + $0x120] sm:$0xff] (%p1532_p4) }
 0x1e0   : > { %903 = vst [vmem:[%s1680_s21 + $0xe8] sm:$0xff] %v798_v37  ;;  %v1098_v37 = vld [vmem:[%s1680_s21 + $0x128] sm:$0xff] (%p1532_p4) }
 0x1e1   : > { %1049 = vst [vmem:[%s1882_s26 + $0x60] sm:$0xff] (%p1532_p4), %v1048_v6 }
 0x1e2   : > { %1051 = vst [vmem:[%s1882_s26 + $0x68] sm:$0xff] (%p1532_p4), %v1050_v7 }
 0x1e3   : > { %1093 = vst [vmem:[%s1882_s26 + $0x410] sm:$0xff] (%p1532_p4), %v1092_v33  ;;  %v1220_v33 = vld [vmem:[%s1680_s21 + $0x310] sm:$0xff] (%p1532_p4) }
 0x1e4   : > { %v827_v36 = vpop.f32.mrf.mxu2  ;;  %v1052_v8 = vld [vmem:[%s1680_s21 + $0x70] sm:$0xff] (%p1532_p4)  ;;  %1095 = vst [vmem:[%s1882_s26 + $0x418] sm:$0xff] (%p1532_p4), %v1094_v34  ;;  %v1222_v34 = vld [vmem:[%s1680_s21 + $0x318] sm:$0xff] (%p1532_p4) }
 0x1e5   : > { %v856_v38 = vpop.f32.mrf.mxu3  ;;  %904 = vst [vmem:[%s1680_s21 + $0xf0] sm:$0xff] %v827_v36  ;;  %v772_v39 = vpop.f32.mrf.mxu0  ;;  %v1054_v9 = vld [vmem:[%s1680_s21 + $0x78] sm:$0xff] (%p1532_p4)  ;;  %v1100_v36 = vld [vmem:[%s1680_s21 + $0x130] sm:$0xff] (%p1532_p4) }
 0x1e6   : > { %v801_v17 = vpop.f32.mrf.mxu1  ;;  %905 = vst [vmem:[%s1680_s21 + $0xf8] sm:$0xff] %v856_v38  ;;  %v1080_v26 = vld [vmem:[%s1680_s21 + $0xe0] sm:$0xff] (%p1532_p4)  ;;  %v1102_v38 = vld [vmem:[%s1680_s21 + $0x138] sm:$0xff] (%p1532_p4) }
 0x1e7   : > { %918 = vst [vmem:[%s1680_s21 + $0x160] sm:$0xff] %v772_v39  ;;  %v1082_v27 = vld [vmem:[%s1680_s21 + $0xe8] sm:$0xff] (%p1532_p4)  ;;  %v1104_v39 = vld [vmem:[%s1680_s21 + $0x140] sm:$0xff] (%p1532_p4) }
 0x1e8   : > { %919 = vst [vmem:[%s1680_s21 + $0x168] sm:$0xff] %v801_v17  ;;  %v1106_v17 = vld [vmem:[%s1680_s21 + $0x148] sm:$0xff] (%p1532_p4) }
 0x1e9   : > { %1053 = vst [vmem:[%s1882_s26 + $0x70] sm:$0xff] (%p1532_p4), %v1052_v8 }
 0x1ea   : > { %1055 = vst [vmem:[%s1882_s26 + $0x78] sm:$0xff] (%p1532_p4), %v1054_v9 }
 0x1eb   : > { %1081 = vst [vmem:[%s1882_s26 + $0x260] sm:$0xff] (%p1532_p4), %v1080_v26 }
 0x1ec   : > { %v830_v63 = vpop.f32.mrf.mxu2  ;;  %v1084_v28 = vld [vmem:[%s1680_s21 + $0xf0] sm:$0xff] (%p1532_p4)  ;;  %1083 = vst [vmem:[%s1882_s26 + $0x268] sm:$0xff] (%p1532_p4), %v1082_v27 }
 0x1ed   : > { %v859_v40 = vpop.f32.mrf.mxu3  ;;  %920 = vst [vmem:[%s1680_s21 + $0x170] sm:$0xff] %v830_v63  ;;  %v774_v18 = vpop.f32.mrf.mxu0  ;;  %v1086_v29 = vld [vmem:[%s1680_s21 + $0xf8] sm:$0xff] (%p1532_p4)  ;;  %v1108_v63 = vld [vmem:[%s1680_s21 + $0x150] sm:$0xff] (%p1532_p4) }
 0x1ee   : > { %v803_v41 = vpop.f32.mrf.mxu1  ;;  %921 = vst [vmem:[%s1680_s21 + $0x178] sm:$0xff] %v859_v40  ;;  %v1110_v40 = vld [vmem:[%s1680_s21 + $0x158] sm:$0xff] (%p1532_p4) }
 0x1ef   : > { %934 = vst [vmem:[%s1680_s21 + $0x1e0] sm:$0xff] %v774_v18  ;;  %v1112_v18 = vld [vmem:[%s1680_s21 + $0x160] sm:$0xff] (%p1532_p4) }
 0x1f0   : > { %935 = vst [vmem:[%s1680_s21 + $0x1e8] sm:$0xff] %v803_v41  ;;  %v1114_v41 = vld [vmem:[%s1680_s21 + $0x168] sm:$0xff] (%p1532_p4) }
 0x1f1   : > { %1085 = vst [vmem:[%s1882_s26 + $0x270] sm:$0xff] (%p1532_p4), %v1084_v28 }
 0x1f2   : > { %1087 = vst [vmem:[%s1882_s26 + $0x278] sm:$0xff] (%p1532_p4), %v1086_v29 }
 0x1f3   : > { %1097 = vst [vmem:[%s1882_s26 + $0x420] sm:$0xff] (%p1532_p4), %v1096_v35  ;;  %v1224_v35 = vld [vmem:[%s1680_s21 + $0x320] sm:$0xff] (%p1532_p4) }
 0x1f4   : > { %v832_v42 = vpop.f32.mrf.mxu2  ;;  %1099 = vst [vmem:[%s1882_s26 + $0x428] sm:$0xff] (%p1532_p4), %v1098_v37  ;;  %v1226_v37 = vld [vmem:[%s1680_s21 + $0x328] sm:$0xff] (%p1532_p4) }
 0x1f5   : > { %v861_v43 = vpop.f32.mrf.mxu3  ;;  %936 = vst [vmem:[%s1680_s21 + $0x1f0] sm:$0xff] %v832_v42  ;;  %v777_v44 = vpop.f32.mrf.mxu0  ;;  %v1116_v42 = vld [vmem:[%s1680_s21 + $0x170] sm:$0xff] (%p1532_p4) }
 0x1f6   : > { %v806_v45 = vpop.f32.mrf.mxu1  ;;  %937 = vst [vmem:[%s1680_s21 + $0x1f8] sm:$0xff] %v861_v43  ;;  %v1118_v43 = vld [vmem:[%s1680_s21 + $0x178] sm:$0xff] (%p1532_p4) }
 0x1f7   : > { %950 = vst [vmem:[%s1680_s21 + $0x260] sm:$0xff] %v777_v44  ;;  %v1120_v44 = vld [vmem:[%s1680_s21 + $0x180] sm:$0xff] (%p1532_p4) }
 0x1f8   : > { %951 = vst [vmem:[%s1680_s21 + $0x268] sm:$0xff] %v806_v45  ;;  %v1122_v45 = vld [vmem:[%s1680_s21 + $0x188] sm:$0xff] (%p1532_p4) }
 0x1f9   : > { %1101 = vst [vmem:[%s1882_s26 + $0x430] sm:$0xff] (%p1532_p4), %v1100_v36  ;;  %v1228_v36 = vld [vmem:[%s1680_s21 + $0x330] sm:$0xff] (%p1532_p4) }
 0x1fa   : > { %1103 = vst [vmem:[%s1882_s26 + $0x438] sm:$0xff] (%p1532_p4), %v1102_v38  ;;  %v1230_v38 = vld [vmem:[%s1680_s21 + $0x338] sm:$0xff] (%p1532_p4) }
 0x1fb   : > { %1105 = vst [vmem:[%s1882_s26 + $0x440] sm:$0xff] (%p1532_p4), %v1104_v39  ;;  %v1232_v39 = vld [vmem:[%s1680_s21 + $0x340] sm:$0xff] (%p1532_p4) }
 0x1fc   : > { %v835_v46 = vpop.f32.mrf.mxu2  ;;  %1107 = vst [vmem:[%s1882_s26 + $0x448] sm:$0xff] (%p1532_p4), %v1106_v17  ;;  %v1234_v17 = vld [vmem:[%s1680_s21 + $0x348] sm:$0xff] (%p1532_p4) }
 0x1fd   : > { %v864_v47 = vpop.f32.mrf.mxu3  ;;  %952 = vst [vmem:[%s1680_s21 + $0x270] sm:$0xff] %v835_v46  ;;  %v779_v48 = vpop.f32.mrf.mxu0  ;;  %v1124_v46 = vld [vmem:[%s1680_s21 + $0x190] sm:$0xff] (%p1532_p4) }
 0x1fe   : > { %v808_v49 = vpop.f32.mrf.mxu1  ;;  %953 = vst [vmem:[%s1680_s21 + $0x278] sm:$0xff] %v864_v47  ;;  %v1126_v47 = vld [vmem:[%s1680_s21 + $0x198] sm:$0xff] (%p1532_p4)  ;;  %v1176_v6 = vld [vmem:[%s1680_s21 + $0x260] sm:$0xff] (%p1532_p4) }
 0x1ff   : > { %966 = vst [vmem:[%s1680_s21 + $0x2e0] sm:$0xff] %v779_v48  ;;  %v1128_v48 = vld [vmem:[%s1680_s21 + $0x1a0] sm:$0xff] (%p1532_p4)  ;;  %v1178_v7 = vld [vmem:[%s1680_s21 + $0x268] sm:$0xff] (%p1532_p4) }
 0x200   : > { %967 = vst [vmem:[%s1680_s21 + $0x2e8] sm:$0xff] %v808_v49  ;;  %v1130_v49 = vld [vmem:[%s1680_s21 + $0x1a8] sm:$0xff] (%p1532_p4) }
 0x201   : > { %1109 = vst [vmem:[%s1882_s26 + $0x450] sm:$0xff] (%p1532_p4), %v1108_v63  ;;  %v1236_v63 = vld [vmem:[%s1680_s21 + $0x350] sm:$0xff] (%p1532_p4) }
 0x202   : > { %1111 = vst [vmem:[%s1882_s26 + $0x458] sm:$0xff] (%p1532_p4), %v1110_v40  ;;  %v1238_v40 = vld [vmem:[%s1680_s21 + $0x358] sm:$0xff] (%p1532_p4) }
 0x203   : > { %1113 = vst [vmem:[%s1882_s26 + $0x460] sm:$0xff] (%p1532_p4), %v1112_v18 }
 0x204   : > { %v837_v19 = vpop.f32.mrf.mxu2  ;;  %1115 = vst [vmem:[%s1882_s26 + $0x468] sm:$0xff] (%p1532_p4), %v1114_v41  ;;  %v1180_v8 = vld [vmem:[%s1680_s21 + $0x270] sm:$0xff] (%p1532_p4) }
 0x205   : > { %v866_v50 = vpop.f32.mrf.mxu3  ;;  %968 = vst [vmem:[%s1680_s21 + $0x2f0] sm:$0xff] %v837_v19  ;;  %v782_v51 = vpop.f32.mrf.mxu0  ;;  %v1132_v19 = vld [vmem:[%s1680_s21 + $0x1b0] sm:$0xff] (%p1532_p4)  ;;  %v1182_v9 = vld [vmem:[%s1680_s21 + $0x278] sm:$0xff] (%p1532_p4) }
 0x206   : > { %v811_v52 = vpop.f32.mrf.mxu1  ;;  %969 = vst [vmem:[%s1680_s21 + $0x2f8] sm:$0xff] %v866_v50  ;;  %v1134_v50 = vld [vmem:[%s1680_s21 + $0x1b8] sm:$0xff] (%p1532_p4)  ;;  %v1208_v26 = vld [vmem:[%s1680_s21 + $0x2e0] sm:$0xff] (%p1532_p4) }
 0x207   : > { %982 = vst [vmem:[%s1680_s21 + $0x360] sm:$0xff] %v782_v51  ;;  %v1136_v51 = vld [vmem:[%s1680_s21 + $0x1c0] sm:$0xff] (%p1532_p4)  ;;  %v1210_v27 = vld [vmem:[%s1680_s21 + $0x2e8] sm:$0xff] (%p1532_p4) }
 0x208   : > { %983 = vst [vmem:[%s1680_s21 + $0x368] sm:$0xff] %v811_v52  ;;  %v1138_v52 = vld [vmem:[%s1680_s21 + $0x1c8] sm:$0xff] (%p1532_p4) }
 0x209   : > { %1117 = vst [vmem:[%s1882_s26 + $0x470] sm:$0xff] (%p1532_p4), %v1116_v42 }
 0x20a   : > { %1119 = vst [vmem:[%s1882_s26 + $0x478] sm:$0xff] (%p1532_p4), %v1118_v43 }
 0x20b   : > { %1121 = vst [vmem:[%s1882_s26 + $0x600] sm:$0xff] (%p1532_p4), %v1120_v44  ;;  %v1248_v44 = vld [vmem:[%s1680_s21 + $0x380] sm:$0xff] (%p1532_p4) }
 0x20c   : > { %v840_v20 = vpop.f32.mrf.mxu2  ;;  %1123 = vst [vmem:[%s1882_s26 + $0x608] sm:$0xff] (%p1532_p4), %v1122_v45  ;;  %v1212_v28 = vld [vmem:[%s1680_s21 + $0x2f0] sm:$0xff] (%p1532_p4)  ;;  %v1250_v45 = vld [vmem:[%s1680_s21 + $0x388] sm:$0xff] (%p1532_p4) }
 0x20d   : > { %v869_v32 = vpop.f32.mrf.mxu3  ;;  %984 = vst [vmem:[%s1680_s21 + $0x370] sm:$0xff] %v840_v20  ;;  %v784_v53 = vpop.f32.mrf.mxu0  ;;  %v1140_v20 = vld [vmem:[%s1680_s21 + $0x1d0] sm:$0xff] (%p1532_p4)  ;;  %v1214_v29 = vld [vmem:[%s1680_s21 + $0x2f8] sm:$0xff] (%p1532_p4) }
 0x20e   : > { %v813_v54 = vpop.f32.mrf.mxu1  ;;  %985 = vst [vmem:[%s1680_s21 + $0x378] sm:$0xff] %v869_v32  ;;  %v1142_v32 = vld [vmem:[%s1680_s21 + $0x1d8] sm:$0xff] (%p1532_p4)  ;;  %v1240_v18 = vld [vmem:[%s1680_s21 + $0x360] sm:$0xff] (%p1532_p4) }
 0x20f   : > { %998 = vst [vmem:[%s1680_s21 + $0x3e0] sm:$0xff] %v784_v53  ;;  %v1144_v53 = vld [vmem:[%s1680_s21 + $0x1e0] sm:$0xff] (%p1532_p4)  ;;  %v1242_v41 = vld [vmem:[%s1680_s21 + $0x368] sm:$0xff] (%p1532_p4) }
 0x210   : > { %999 = vst [vmem:[%s1680_s21 + $0x3e8] sm:$0xff] %v813_v54  ;;  %v1146_v54 = vld [vmem:[%s1680_s21 + $0x1e8] sm:$0xff] (%p1532_p4) }
 0x211   : > { %1125 = vst [vmem:[%s1882_s26 + $0x610] sm:$0xff] (%p1532_p4), %v1124_v46  ;;  %v1252_v46 = vld [vmem:[%s1680_s21 + $0x390] sm:$0xff] (%p1532_p4) }
 0x212   : > { %1008 = sbr.rel (!%p1532_p4) target bundleno = 599 (0x257), region = 40  ;;  %1127 = vst [vmem:[%s1882_s26 + $0x618] sm:$0xff] (%p1532_p4), %v1126_v47  ;;  %v1254_v47 = vld [vmem:[%s1680_s21 + $0x398] sm:$0xff] (%p1532_p4) }
 0x213   : > { %1129 = vst [vmem:[%s1882_s26 + $0x620] sm:$0xff] (%p1532_p4), %v1128_v48  ;;  %v1256_v48 = vld [vmem:[%s1680_s21 + $0x3a0] sm:$0xff] (%p1532_p4) }
 0x214   : > { %v842_v55 = vpop.f32.mrf.mxu2  ;;  %1131 = vst [vmem:[%s1882_s26 + $0x628] sm:$0xff] (%p1532_p4), %v1130_v49  ;;  %v1244_v42 = vld [vmem:[%s1680_s21 + $0x370] sm:$0xff] (%p1532_p4)  ;;  %v1258_v49 = vld [vmem:[%s1680_s21 + $0x3a8] sm:$0xff] (%p1532_p4) }
 0x215   : > { %v871_v57 = vpop.f32.mrf.mxu3  ;;  %1000 = vst [vmem:[%s1680_s21 + $0x3f0] sm:$0xff] %v842_v55  ;;  %v1148_v55 = vld [vmem:[%s1680_s21 + $0x1f0] sm:$0xff] (%p1532_p4)  ;;  %v1246_v43 = vld [vmem:[%s1680_s21 + $0x378] sm:$0xff] (%p1532_p4) }
 0x216   : > { %1001 = vst [vmem:[%s1680_s21 + $0x3f8] sm:$0xff] %v871_v57  ;;  %v1150_v57 = vld [vmem:[%s1680_s21 + $0x1f8] sm:$0xff] (%p1532_p4) }
 0x217   : > { %1133 = vst [vmem:[%s1882_s26 + $0x630] sm:$0xff] %v1132_v19  ;;  %v1260_v19 = vld [vmem:[%s1680_s21 + $0x3b0] sm:$0xff] }
 0x218   : > { %1135 = vst [vmem:[%s1882_s26 + $0x638] sm:$0xff] %v1134_v50  ;;  %v1262_v50 = vld [vmem:[%s1680_s21 + $0x3b8] sm:$0xff] }
 0x219   : > { %1137 = vst [vmem:[%s1882_s26 + $0x640] sm:$0xff] %v1136_v51  ;;  %v1264_v51 = vld [vmem:[%s1680_s21 + $0x3c0] sm:$0xff] }
 0x21a   : > { %1139 = vst [vmem:[%s1882_s26 + $0x648] sm:$0xff] %v1138_v52  ;;  %v1266_v52 = vld [vmem:[%s1680_s21 + $0x3c8] sm:$0xff] }
 0x21b   : > { %1141 = vst [vmem:[%s1882_s26 + $0x650] sm:$0xff] %v1140_v20  ;;  %v1268_v20 = vld [vmem:[%s1680_s21 + $0x3d0] sm:$0xff] }
 0x21c   : > { %1143 = vst [vmem:[%s1882_s26 + $0x658] sm:$0xff] %v1142_v32  ;;  %v1270_v32 = vld [vmem:[%s1680_s21 + $0x3d8] sm:$0xff] }
 0x21d   : > { %1145 = vst [vmem:[%s1882_s26 + $0x660] sm:$0xff] %v1144_v53  ;;  %v1272_v53 = vld [vmem:[%s1680_s21 + $0x3e0] sm:$0xff] }
 0x21e   : > { %1147 = vst [vmem:[%s1882_s26 + $0x668] sm:$0xff] %v1146_v54  ;;  %v1274_v54 = vld [vmem:[%s1680_s21 + $0x3e8] sm:$0xff] }
 0x21f   : > { %1149 = vst [vmem:[%s1882_s26 + $0x670] sm:$0xff] %v1148_v55  ;;  %v1276_v55 = vld [vmem:[%s1680_s21 + $0x3f0] sm:$0xff] }
 0x220   : > { %1151 = vst [vmem:[%s1882_s26 + $0x678] sm:$0xff] %v1150_v57  ;;  %v1278_v57 = vld [vmem:[%s1680_s21 + $0x3f8] sm:$0xff] }
 0x221   : > { %1173 = vst [vmem:[%s1882_s26 + $0x850] sm:$0xff] %v1172_v4 }
 0x222   : > { %1175 = vst [vmem:[%s1882_s26 + $0x858] sm:$0xff] %v1174_v5 }
 0x223   : > { %1177 = vst [vmem:[%s1882_s26 + $0x860] sm:$0xff] %v1176_v6 }
 0x224   : > { %1179 = vst [vmem:[%s1882_s26 + $0x868] sm:$0xff] %v1178_v7 }
 0x225   : > { %1181 = vst [vmem:[%s1882_s26 + $0x870] sm:$0xff] %v1180_v8 }
 0x226   : > { %1183 = vst [vmem:[%s1882_s26 + $0x878] sm:$0xff] %v1182_v9 }
 0x227   : > { %1185 = vst [vmem:[%s1882_s26 + $0xa00] sm:$0xff] %v1184_v10 }
 0x228   : > { %1187 = vst [vmem:[%s1882_s26 + $0xa08] sm:$0xff] %v1186_v11 }
 0x229   : > { %1189 = vst [vmem:[%s1882_s26 + $0xa10] sm:$0xff] %v1188_v12 }
 0x22a   : > { %1191 = vst [vmem:[%s1882_s26 + $0xa18] sm:$0xff] %v1190_v13 }
 0x22b   : > { %1193 = vst [vmem:[%s1882_s26 + $0xa20] sm:$0xff] %v1192_v14 }
 0x22c   : > { %1195 = vst [vmem:[%s1882_s26 + $0xa28] sm:$0xff] %v1194_v15 }
 0x22d   : > { %1197 = vst [vmem:[%s1882_s26 + $0xa30] sm:$0xff] %v1196_v16 }
 0x22e   : > { %1199 = vst [vmem:[%s1882_s26 + $0xa38] sm:$0xff] %v1198_v21 }
 0x22f   : > { %1201 = vst [vmem:[%s1882_s26 + $0xa40] sm:$0xff] %v1200_v22 }
 0x230   : > { %1203 = vst [vmem:[%s1882_s26 + $0xa48] sm:$0xff] %v1202_v23 }
 0x231   : > { %1205 = vst [vmem:[%s1882_s26 + $0xa50] sm:$0xff] %v1204_v24 }
 0x232   : > { %1207 = vst [vmem:[%s1882_s26 + $0xa58] sm:$0xff] %v1206_v25 }
 0x233   : > { %1209 = vst [vmem:[%s1882_s26 + $0xa60] sm:$0xff] %v1208_v26 }
 0x234   : > { %1211 = vst [vmem:[%s1882_s26 + $0xa68] sm:$0xff] %v1210_v27 }
 0x235   : > { %1213 = vst [vmem:[%s1882_s26 + $0xa70] sm:$0xff] %v1212_v28 }
 0x236   : > { %1215 = vst [vmem:[%s1882_s26 + $0xa78] sm:$0xff] %v1214_v29 }
 0x237   : > { %1217 = vst [vmem:[%s1882_s26 + $0xc00] sm:$0xff] %v1216_v30 }
 0x238   : > { %1219 = vst [vmem:[%s1882_s26 + $0xc08] sm:$0xff] %v1218_v31 }
 0x239   : > { %1221 = vst [vmem:[%s1882_s26 + $0xc10] sm:$0xff] %v1220_v33 }
 0x23a   : > { %1223 = vst [vmem:[%s1882_s26 + $0xc18] sm:$0xff] %v1222_v34 }
 0x23b   : > { %1225 = vst [vmem:[%s1882_s26 + $0xc20] sm:$0xff] %v1224_v35 }
 0x23c   : > { %1227 = vst [vmem:[%s1882_s26 + $0xc28] sm:$0xff] %v1226_v37 }
 0x23d   : > { %1229 = vst [vmem:[%s1882_s26 + $0xc30] sm:$0xff] %v1228_v36 }
 0x23e   : > { %1231 = vst [vmem:[%s1882_s26 + $0xc38] sm:$0xff] %v1230_v38 }
 0x23f   : > { %1233 = vst [vmem:[%s1882_s26 + $0xc40] sm:$0xff] %v1232_v39 }
 0x240   : > { %1235 = vst [vmem:[%s1882_s26 + $0xc48] sm:$0xff] %v1234_v17 }
 0x241   : > { %1237 = vst [vmem:[%s1882_s26 + $0xc50] sm:$0xff] %v1236_v63 }
 0x242   : > { %1239 = vst [vmem:[%s1882_s26 + $0xc58] sm:$0xff] %v1238_v40 }
 0x243   : > { %1241 = vst [vmem:[%s1882_s26 + $0xc60] sm:$0xff] %v1240_v18 }
 0x244   : > { %1243 = vst [vmem:[%s1882_s26 + $0xc68] sm:$0xff] %v1242_v41 }
 0x245   : > { %1245 = vst [vmem:[%s1882_s26 + $0xc70] sm:$0xff] %v1244_v42 }
 0x246   : > { %1247 = vst [vmem:[%s1882_s26 + $0xc78] sm:$0xff] %v1246_v43 }
 0x247   : > { %1249 = vst [vmem:[%s1882_s26 + $0xe00] sm:$0xff] %v1248_v44 }
 0x248   : > { %1251 = vst [vmem:[%s1882_s26 + $0xe08] sm:$0xff] %v1250_v45 }
 0x249   : > { %1253 = vst [vmem:[%s1882_s26 + $0xe10] sm:$0xff] %v1252_v46 }
 0x24a   : > { %1255 = vst [vmem:[%s1882_s26 + $0xe18] sm:$0xff] %v1254_v47 }
 0x24b   : > { %1257 = vst [vmem:[%s1882_s26 + $0xe20] sm:$0xff] %v1256_v48 }
 0x24c   : > { %1259 = vst [vmem:[%s1882_s26 + $0xe28] sm:$0xff] %v1258_v49 }
 0x24d   : > { %1261 = vst [vmem:[%s1882_s26 + $0xe30] sm:$0xff] %v1260_v19 }
 0x24e   : > { %1263 = vst [vmem:[%s1882_s26 + $0xe38] sm:$0xff] %v1262_v50 }
 0x24f   : > { %1265 = vst [vmem:[%s1882_s26 + $0xe40] sm:$0xff] %v1264_v51 }
 0x250   : > { %1267 = vst [vmem:[%s1882_s26 + $0xe48] sm:$0xff] %v1266_v52 }
 0x251   : > { %1269 = vst [vmem:[%s1882_s26 + $0xe50] sm:$0xff] %v1268_v20 }
 0x252   : > { %1271 = vst [vmem:[%s1882_s26 + $0xe58] sm:$0xff] %v1270_v32 }
 0x253   : > { %1273 = vst [vmem:[%s1882_s26 + $0xe60] sm:$0xff] %v1272_v53 }
 0x254   : > { %1275 = vst [vmem:[%s1882_s26 + $0xe68] sm:$0xff] %v1274_v54 }
 0x255   : > { %1277 = vst [vmem:[%s1882_s26 + $0xe70] sm:$0xff] %v1276_v55 }
 0x256   : > { %1279 = vst [vmem:[%s1882_s26 + $0xe78] sm:$0xff] %v1278_v57 }
 0x257 PF: > { %p11_p8 = scmp.ge.s32.totalorder %s1522_s19, 6   ;;  %s2154_s15 = smov %s1475_s16 }
 0x258   : > { %s2155_s16 = smov %s1530_s22  ;;  %s2156_s17 = smov %s1522_s19 }
 0x259   :  { %13 = sbr.rel (!%p11_p8) target bundleno = 2 (0x2), region = 89 }

// kernel: decoder_forward.7
= control target key start
LH: loop header
LB: loop body
LE: loop exit
PB: predicated region body
PF: predicated region fallthrough
CT: control target
= control target key end

     0   :  { %s790_s0 = inlined_call_operand.vmem [shape: f32[64,1024], index: 0, kind: input, shape index: {}]   ;;  %s791_s1 = inlined_call_operand.vmem [shape: f32[64,1024], index: 1, kind: output, shape index: {}]  }
   0x1   :  { %v8_v0 = vld [vmem:[%s790_s0] sm:$0xff]  ;;  %v9_v1 = vld [vmem:[%s790_s0 + $0x8] sm:$0xff]  ;;  %v10_v2 = vld [vmem:[%s790_s0 + $0x10] sm:$0xff] }
   0x2   :  { %v72_v3 = vmul.f32 1.442695, %v8_v0  ;;  %v74_v4 = vmul.f32 1.442695, %v9_v1  ;;  %v76_v5 = vmul.f32 1.442695, %v10_v2 }
   0x3   :  { %v11_v6 = vld [vmem:[%s790_s0 + $0x18] sm:$0xff]  ;;  %v12_v7 = vld [vmem:[%s790_s0 + $0x20] sm:$0xff]  ;;  %v13_v8 = vld [vmem:[%s790_s0 + $0x28] sm:$0xff] }
   0x4   :  { %268 = vpow2.f32 %v72_v3  ;;  %v78_v9 = vmul.f32 1.442695, %v11_v6  ;;  %v80_v10 = vmul.f32 1.442695, %v12_v7  ;;  %v82_v11 = vmul.f32 1.442695, %v13_v8 }
   0x5   :  { %270 = vpow2.f32 %v74_v4  ;;  %v14_v12 = vld [vmem:[%s790_s0 + $0x30] sm:$0xff]  ;;  %v15_v13 = vld [vmem:[%s790_s0 + $0x38] sm:$0xff]  ;;  %v16_v14 = vld [vmem:[%s790_s0 + $0x40] sm:$0xff] }
   0x6   :  { %272 = vpow2.f32 %v76_v5  ;;  %v84_v15 = vmul.f32 1.442695, %v14_v12  ;;  %v86_v16 = vmul.f32 1.442695, %v15_v13  ;;  %v17_v17 = vld [vmem:[%s790_s0 + $0x48] sm:$0xff]  ;;  %v18_v18 = vld [vmem:[%s790_s0 + $0x50] sm:$0xff] }
   0x7   :  { %274 = vpow2.f32 %v78_v9  ;;  %v88_v19 = vmul.f32 1.442695, %v16_v14  ;;  %v19_v20 = vld [vmem:[%s790_s0 + $0x58] sm:$0xff]  ;;  %v90_v21 = vmul.f32 1.442695, %v17_v17  ;;  %v20_v22 = vld [vmem:[%s790_s0 + $0x60] sm:$0xff] }
   0x8   :  { %276 = vpow2.f32 %v80_v10  ;;  %v92_v24 = vmul.f32 1.442695, %v18_v18  ;;  %v21_v25 = vld [vmem:[%s790_s0 + $0x68] sm:$0xff]  ;;  %v94_v27 = vmul.f32 1.442695, %v19_v20  ;;  %v22_v28 = vld [vmem:[%s790_s0 + $0x70] sm:$0xff] }
   0x9   :  { %278 = vpow2.f32 %v82_v11  ;;  %v96_v30 = vmul.f32 1.442695, %v20_v22  ;;  %v23_v31 = vld [vmem:[%s790_s0 + $0x78] sm:$0xff]  ;;  %v98_v33 = vmul.f32 1.442695, %v21_v25  ;;  %v24_v34 = vld [vmem:[%s790_s0 + $0x80] sm:$0xff] }
   0xa   :  { %v269_v23 = vpop.eup %268  ;;  %280 = vpow2.f32 %v84_v15  ;;  %v100_v36 = vmul.f32 1.442695, %v22_v28  ;;  %v25_v37 = vld [vmem:[%s790_s0 + $0x88] sm:$0xff]  ;;  %v102_v39 = vmul.f32 1.442695, %v23_v31  ;;  %v26_v40 = vld [vmem:[%s790_s0 + $0x90] sm:$0xff] }
   0xb   :  { %v271_v26 = vpop.eup %270  ;;  %200 = vst [vmem:[%s791_s1] sm:$0xff] %v269_v23  ;;  %282 = vpow2.f32 %v86_v16  ;;  %v104_v42 = vmul.f32 1.442695, %v24_v34  ;;  %v27_v43 = vld [vmem:[%s790_s0 + $0x98] sm:$0xff]  ;;  %v106_v45 = vmul.f32 1.442695, %v25_v37  ;;  %v28_v46 = vld [vmem:[%s790_s0 + $0xa0] sm:$0xff] }
   0xc   :  { %v273_v29 = vpop.eup %272  ;;  %201 = vst [vmem:[%s791_s1 + $0x8] sm:$0xff] %v271_v26  ;;  %284 = vpow2.f32 %v88_v19  ;;  %v108_v48 = vmul.f32 1.442695, %v26_v40  ;;  %v29_v49 = vld [vmem:[%s790_s0 + $0xa8] sm:$0xff]  ;;  %v110_v51 = vmul.f32 1.442695, %v27_v43 }
   0xd   :  { %v275_v32 = vpop.eup %274  ;;  %202 = vst [vmem:[%s791_s1 + $0x10] sm:$0xff] %v273_v29  ;;  %286 = vpow2.f32 %v90_v21  ;;  %v30_v52 = vld [vmem:[%s790_s0 + $0xb0] sm:$0xff]  ;;  %v112_v54 = vmul.f32 1.442695, %v28_v46  ;;  %v31_v55 = vld [vmem:[%s790_s0 + $0xb8] sm:$0xff]  ;;  %v32_v58 = vld [vmem:[%s790_s0 + $0xc0] sm:$0xff] }
   0xe   :  { %v277_v35 = vpop.eup %276  ;;  %203 = vst [vmem:[%s791_s1 + $0x18] sm:$0xff] %v275_v32  ;;  %288 = vpow2.f32 %v92_v24  ;;  %v114_v57 = vmul.f32 1.442695, %v29_v49  ;;  %v116_v60 = vmul.f32 1.442695, %v30_v52  ;;  %v33_v61 = vld [vmem:[%s790_s0 + $0xc8] sm:$0xff] }
   0xf   :  { %v279_v38 = vpop.eup %278  ;;  %204 = vst [vmem:[%s791_s1 + $0x20] sm:$0xff] %v277_v35  ;;  %290 = vpow2.f32 %v94_v27  ;;  %v118_v63 = vmul.f32 1.442695, %v31_v55  ;;  %v34_v0 = vld [vmem:[%s790_s0 + $0xd0] sm:$0xff]  ;;  %v120_v2 = vmul.f32 1.442695, %v32_v58 }
  0x10   :  { %v281_v41 = vpop.eup %280  ;;  %205 = vst [vmem:[%s791_s1 + $0x28] sm:$0xff] %v279_v38  ;;  %292 = vpow2.f32 %v96_v30  ;;  %v35_v3 = vld [vmem:[%s790_s0 + $0xd8] sm:$0xff]  ;;  %v122_v5 = vmul.f32 1.442695, %v33_v61  ;;  %v36_v6 = vld [vmem:[%s790_s0 + $0xe0] sm:$0xff]  ;;  %v37_v9 = vld [vmem:[%s790_s0 + $0xe8] sm:$0xff] }
  0x11   :  { %v283_v44 = vpop.eup %282  ;;  %206 = vst [vmem:[%s791_s1 + $0x30] sm:$0xff] %v281_v41  ;;  %294 = vpow2.f32 %v98_v33  ;;  %v124_v8 = vmul.f32 1.442695, %v34_v0  ;;  %v126_v11 = vmul.f32 1.442695, %v35_v3  ;;  %v38_v12 = vld [vmem:[%s790_s0 + $0xf0] sm:$0xff] }
  0x12   :  { %v285_v47 = vpop.eup %284  ;;  %207 = vst [vmem:[%s791_s1 + $0x38] sm:$0xff] %v283_v44  ;;  %296 = vpow2.f32 %v100_v36  ;;  %v128_v14 = vmul.f32 1.442695, %v36_v6  ;;  %v39_v15 = vld [vmem:[%s790_s0 + $0xf8] sm:$0xff]  ;;  %v130_v17 = vmul.f32 1.442695, %v37_v9 }
  0x13   :  { %v287_v50 = vpop.eup %286  ;;  %208 = vst [vmem:[%s791_s1 + $0x40] sm:$0xff] %v285_v47  ;;  %298 = vpow2.f32 %v102_v39  ;;  %v40_v18 = vld [vmem:[%s790_s0 + $0x100] sm:$0xff]  ;;  %v132_v20 = vmul.f32 1.442695, %v38_v12  ;;  %v41_v21 = vld [vmem:[%s790_s0 + $0x108] sm:$0xff]  ;;  %v42_v24 = vld [vmem:[%s790_s0 + $0x110] sm:$0xff] }
  0x14   :  { %v289_v53 = vpop.eup %288  ;;  %209 = vst [vmem:[%s791_s1 + $0x48] sm:$0xff] %v287_v50  ;;  %300 = vpow2.f32 %v104_v42  ;;  %v134_v23 = vmul.f32 1.442695, %v39_v15  ;;  %v136_v26 = vmul.f32 1.442695, %v40_v18  ;;  %v43_v27 = vld [vmem:[%s790_s0 + $0x118] sm:$0xff] }
  0x15   :  { %v291_v56 = vpop.eup %290  ;;  %210 = vst [vmem:[%s791_s1 + $0x50] sm:$0xff] %v289_v53  ;;  %302 = vpow2.f32 %v106_v45  ;;  %v138_v29 = vmul.f32 1.442695, %v41_v21  ;;  %v44_v30 = vld [vmem:[%s790_s0 + $0x120] sm:$0xff]  ;;  %v140_v32 = vmul.f32 1.442695, %v42_v24 }
  0x16   :  { %v293_v59 = vpop.eup %292  ;;  %211 = vst [vmem:[%s791_s1 + $0x58] sm:$0xff] %v291_v56  ;;  %304 = vpow2.f32 %v108_v48  ;;  %v45_v33 = vld [vmem:[%s790_s0 + $0x128] sm:$0xff]  ;;  %v142_v35 = vmul.f32 1.442695, %v43_v27  ;;  %v46_v36 = vld [vmem:[%s790_s0 + $0x130] sm:$0xff]  ;;  %v47_v39 = vld [vmem:[%s790_s0 + $0x138] sm:$0xff] }
  0x17   :  { %v295_v62 = vpop.eup %294  ;;  %212 = vst [vmem:[%s791_s1 + $0x60] sm:$0xff] %v293_v59  ;;  %306 = vpow2.f32 %v110_v51  ;;  %v144_v38 = vmul.f32 1.442695, %v44_v30  ;;  %v146_v41 = vmul.f32 1.442695, %v45_v33  ;;  %v48_v42 = vld [vmem:[%s790_s0 + $0x140] sm:$0xff] }
  0x18   :  { %v297_v1 = vpop.eup %296  ;;  %213 = vst [vmem:[%s791_s1 + $0x68] sm:$0xff] %v295_v62  ;;  %308 = vpow2.f32 %v112_v54  ;;  %v148_v44 = vmul.f32 1.442695, %v46_v36  ;;  %v49_v45 = vld [vmem:[%s790_s0 + $0x148] sm:$0xff]  ;;  %v150_v47 = vmul.f32 1.442695, %v47_v39 }
  0x19   :  { %v299_v4 = vpop.eup %298  ;;  %214 = vst [vmem:[%s791_s1 + $0x70] sm:$0xff] %v297_v1  ;;  %310 = vpow2.f32 %v114_v57  ;;  %v50_v48 = vld [vmem:[%s790_s0 + $0x150] sm:$0xff]  ;;  %v152_v50 = vmul.f32 1.442695, %v48_v42  ;;  %v51_v51 = vld [vmem:[%s790_s0 + $0x158] sm:$0xff]  ;;  %v52_v54 = vld [vmem:[%s790_s0 + $0x160] sm:$0xff] }
  0x1a   :  { %v301_v7 = vpop.eup %300  ;;  %215 = vst [vmem:[%s791_s1 + $0x78] sm:$0xff] %v299_v4  ;;  %312 = vpow2.f32 %v116_v60  ;;  %v154_v53 = vmul.f32 1.442695, %v49_v45  ;;  %v156_v56 = vmul.f32 1.442695, %v50_v48  ;;  %v53_v57 = vld [vmem:[%s790_s0 + $0x168] sm:$0xff] }
  0x1b   :  { %v303_v10 = vpop.eup %302  ;;  %216 = vst [vmem:[%s791_s1 + $0x80] sm:$0xff] %v301_v7  ;;  %314 = vpow2.f32 %v118_v63  ;;  %v158_v59 = vmul.f32 1.442695, %v51_v51  ;;  %v54_v60 = vld [vmem:[%s790_s0 + $0x170] sm:$0xff]  ;;  %v160_v62 = vmul.f32 1.442695, %v52_v54 }
  0x1c   :  { %v305_v13 = vpop.eup %304  ;;  %217 = vst [vmem:[%s791_s1 + $0x88] sm:$0xff] %v303_v10  ;;  %316 = vpow2.f32 %v120_v2  ;;  %v55_v63 = vld [vmem:[%s790_s0 + $0x178] sm:$0xff]  ;;  %v162_v1 = vmul.f32 1.442695, %v53_v57  ;;  %v56_v2 = vld [vmem:[%s790_s0 + $0x180] sm:$0xff] }
  0x1d   :  { %v307_v16 = vpop.eup %306  ;;  %218 = vst [vmem:[%s791_s1 + $0x90] sm:$0xff] %v305_v13  ;;  %318 = vpow2.f32 %v122_v5  ;;  %v164_v4 = vmul.f32 1.442695, %v54_v60  ;;  %v57_v5 = vld [vmem:[%s790_s0 + $0x188] sm:$0xff]  ;;  %v166_v7 = vmul.f32 1.442695, %v55_v63 }
  0x1e   :  { %v309_v19 = vpop.eup %308  ;;  %219 = vst [vmem:[%s791_s1 + $0x98] sm:$0xff] %v307_v16  ;;  %320 = vpow2.f32 %v124_v8  ;;  %v58_v8 = vld [vmem:[%s790_s0 + $0x190] sm:$0xff]  ;;  %v168_v10 = vmul.f32 1.442695, %v56_v2  ;;  %v170_v13 = vmul.f32 1.442695, %v57_v5 }
  0x1f   :  { %v311_v22 = vpop.eup %310  ;;  %220 = vst [vmem:[%s791_s1 + $0xa0] sm:$0xff] %v309_v19  ;;  %322 = vpow2.f32 %v126_v11  ;;  %v59_v11 = vld [vmem:[%s790_s0 + $0x198] sm:$0xff]  ;;  %v172_v16 = vmul.f32 1.442695, %v58_v8 }
  0x20   :  { %v313_v25 = vpop.eup %312  ;;  %221 = vst [vmem:[%s791_s1 + $0xa8] sm:$0xff] %v311_v22  ;;  %324 = vpow2.f32 %v128_v14  ;;  %v60_v14 = vld [vmem:[%s790_s0 + $0x1a0] sm:$0xff]  ;;  %v174_v19 = vmul.f32 1.442695, %v59_v11 }
  0x21   :  { %v315_v28 = vpop.eup %314  ;;  %222 = vst [vmem:[%s791_s1 + $0xb0] sm:$0xff] %v313_v25  ;;  %326 = vpow2.f32 %v130_v17  ;;  %v61_v17 = vld [vmem:[%s790_s0 + $0x1a8] sm:$0xff]  ;;  %v176_v22 = vmul.f32 1.442695, %v60_v14 }
  0x22   :  { %v317_v31 = vpop.eup %316  ;;  %223 = vst [vmem:[%s791_s1 + $0xb8] sm:$0xff] %v315_v28  ;;  %328 = vpow2.f32 %v132_v20  ;;  %v62_v20 = vld [vmem:[%s790_s0 + $0x1b0] sm:$0xff]  ;;  %v178_v25 = vmul.f32 1.442695, %v61_v17 }
  0x23   :  { %v319_v34 = vpop.eup %318  ;;  %224 = vst [vmem:[%s791_s1 + $0xc0] sm:$0xff] %v317_v31  ;;  %330 = vpow2.f32 %v134_v23  ;;  %v63_v23 = vld [vmem:[%s790_s0 + $0x1b8] sm:$0xff]  ;;  %v180_v28 = vmul.f32 1.442695, %v62_v20 }
  0x24   :  { %v321_v37 = vpop.eup %320  ;;  %225 = vst [vmem:[%s791_s1 + $0xc8] sm:$0xff] %v319_v34  ;;  %332 = vpow2.f32 %v136_v26  ;;  %v64_v26 = vld [vmem:[%s790_s0 + $0x1c0] sm:$0xff]  ;;  %v182_v31 = vmul.f32 1.442695, %v63_v23 }
  0x25   :  { %v323_v40 = vpop.eup %322  ;;  %226 = vst [vmem:[%s791_s1 + $0xd0] sm:$0xff] %v321_v37  ;;  %334 = vpow2.f32 %v138_v29  ;;  %v65_v29 = vld [vmem:[%s790_s0 + $0x1c8] sm:$0xff]  ;;  %v184_v34 = vmul.f32 1.442695, %v64_v26 }
  0x26   :  { %v325_v43 = vpop.eup %324  ;;  %227 = vst [vmem:[%s791_s1 + $0xd8] sm:$0xff] %v323_v40  ;;  %336 = vpow2.f32 %v140_v32  ;;  %v66_v32 = vld [vmem:[%s790_s0 + $0x1d0] sm:$0xff]  ;;  %v186_v37 = vmul.f32 1.442695, %v65_v29 }
  0x27   :  { %v327_v46 = vpop.eup %326  ;;  %228 = vst [vmem:[%s791_s1 + $0xe0] sm:$0xff] %v325_v43  ;;  %338 = vpow2.f32 %v142_v35  ;;  %v67_v35 = vld [vmem:[%s790_s0 + $0x1d8] sm:$0xff]  ;;  %v188_v40 = vmul.f32 1.442695, %v66_v32 }
  0x28   :  { %v329_v49 = vpop.eup %328  ;;  %229 = vst [vmem:[%s791_s1 + $0xe8] sm:$0xff] %v327_v46  ;;  %340 = vpow2.f32 %v144_v38  ;;  %v68_v38 = vld [vmem:[%s790_s0 + $0x1e0] sm:$0xff]  ;;  %v190_v43 = vmul.f32 1.442695, %v67_v35 }
  0x29   :  { %v331_v52 = vpop.eup %330  ;;  %230 = vst [vmem:[%s791_s1 + $0xf0] sm:$0xff] %v329_v49  ;;  %342 = vpow2.f32 %v146_v41  ;;  %v69_v41 = vld [vmem:[%s790_s0 + $0x1e8] sm:$0xff]  ;;  %v192_v46 = vmul.f32 1.442695, %v68_v38 }
  0x2a   :  { %v333_v55 = vpop.eup %332  ;;  %231 = vst [vmem:[%s791_s1 + $0xf8] sm:$0xff] %v331_v52  ;;  %344 = vpow2.f32 %v148_v44  ;;  %v70_v44 = vld [vmem:[%s790_s0 + $0x1f0] sm:$0xff]  ;;  %v194_v49 = vmul.f32 1.442695, %v69_v41 }
  0x2b   :  { %v335_v58 = vpop.eup %334  ;;  %232 = vst [vmem:[%s791_s1 + $0x100] sm:$0xff] %v333_v55  ;;  %346 = vpow2.f32 %v150_v47  ;;  %v71_v47 = vld [vmem:[%s790_s0 + $0x1f8] sm:$0xff]  ;;  %v196_v51 = vmul.f32 1.442695, %v70_v44 }
  0x2c   :  { %v337_v61 = vpop.eup %336  ;;  %233 = vst [vmem:[%s791_s1 + $0x108] sm:$0xff] %v335_v58  ;;  %348 = vpow2.f32 %v152_v50 }
  0x2d   :  { %v339_v0 = vpop.eup %338  ;;  %234 = vst [vmem:[%s791_s1 + $0x110] sm:$0xff] %v337_v61  ;;  %350 = vpow2.f32 %v154_v53  ;;  %v198_v53 = vmul.f32 1.442695, %v71_v47 }
  0x2e   :  { %v341_v3 = vpop.eup %340  ;;  %235 = vst [vmem:[%s791_s1 + $0x118] sm:$0xff] %v339_v0  ;;  %352 = vpow2.f32 %v156_v56 }
  0x2f   :  { %v343_v6 = vpop.eup %342  ;;  %236 = vst [vmem:[%s791_s1 + $0x120] sm:$0xff] %v341_v3  ;;  %354 = vpow2.f32 %v158_v59 }
  0x30   :  { %v345_v9 = vpop.eup %344  ;;  %237 = vst [vmem:[%s791_s1 + $0x128] sm:$0xff] %v343_v6  ;;  %356 = vpow2.f32 %v160_v62 }
  0x31   :  { %v347_v12 = vpop.eup %346  ;;  %238 = vst [vmem:[%s791_s1 + $0x130] sm:$0xff] %v345_v9  ;;  %358 = vpow2.f32 %v162_v1 }
  0x32   :  { %v349_v15 = vpop.eup %348  ;;  %239 = vst [vmem:[%s791_s1 + $0x138] sm:$0xff] %v347_v12  ;;  %360 = vpow2.f32 %v164_v4 }
  0x33   :  { %v351_v18 = vpop.eup %350  ;;  %240 = vst [vmem:[%s791_s1 + $0x140] sm:$0xff] %v349_v15  ;;  %362 = vpow2.f32 %v166_v7 }
  0x34   :  { %v353_v21 = vpop.eup %352  ;;  %241 = vst [vmem:[%s791_s1 + $0x148] sm:$0xff] %v351_v18  ;;  %364 = vpow2.f32 %v168_v10 }
  0x35   :  { %v355_v24 = vpop.eup %354  ;;  %242 = vst [vmem:[%s791_s1 + $0x150] sm:$0xff] %v353_v21  ;;  %366 = vpow2.f32 %v170_v13 }
  0x36   :  { %v357_v27 = vpop.eup %356  ;;  %243 = vst [vmem:[%s791_s1 + $0x158] sm:$0xff] %v355_v24  ;;  %368 = vpow2.f32 %v172_v16 }
  0x37   :  { %v359_v30 = vpop.eup %358  ;;  %244 = vst [vmem:[%s791_s1 + $0x160] sm:$0xff] %v357_v27  ;;  %370 = vpow2.f32 %v174_v19 }
  0x38   :  { %v361_v33 = vpop.eup %360  ;;  %245 = vst [vmem:[%s791_s1 + $0x168] sm:$0xff] %v359_v30  ;;  %372 = vpow2.f32 %v176_v22 }
  0x39   :  { %v363_v36 = vpop.eup %362  ;;  %246 = vst [vmem:[%s791_s1 + $0x170] sm:$0xff] %v361_v33  ;;  %374 = vpow2.f32 %v178_v25 }
  0x3a   :  { %v365_v39 = vpop.eup %364  ;;  %247 = vst [vmem:[%s791_s1 + $0x178] sm:$0xff] %v363_v36  ;;  %376 = vpow2.f32 %v180_v28 }
  0x3b   :  { %v367_v42 = vpop.eup %366  ;;  %248 = vst [vmem:[%s791_s1 + $0x180] sm:$0xff] %v365_v39  ;;  %378 = vpow2.f32 %v182_v31 }
  0x3c   :  { %v369_v45 = vpop.eup %368  ;;  %249 = vst [vmem:[%s791_s1 + $0x188] sm:$0xff] %v367_v42  ;;  %380 = vpow2.f32 %v184_v34 }
  0x3d   :  { %v371_v48 = vpop.eup %370  ;;  %250 = vst [vmem:[%s791_s1 + $0x190] sm:$0xff] %v369_v45  ;;  %382 = vpow2.f32 %v186_v37 }
  0x3e   :  { %v373_v50 = vpop.eup %372  ;;  %251 = vst [vmem:[%s791_s1 + $0x198] sm:$0xff] %v371_v48  ;;  %384 = vpow2.f32 %v188_v40 }
  0x3f   :  { %v375_v52 = vpop.eup %374  ;;  %252 = vst [vmem:[%s791_s1 + $0x1a0] sm:$0xff] %v373_v50  ;;  %386 = vpow2.f32 %v190_v43 }
  0x40   :  { %v377_v54 = vpop.eup %376  ;;  %253 = vst [vmem:[%s791_s1 + $0x1a8] sm:$0xff] %v375_v52  ;;  %388 = vpow2.f32 %v192_v46 }
  0x41   :  { %v379_v55 = vpop.eup %378  ;;  %254 = vst [vmem:[%s791_s1 + $0x1b0] sm:$0xff] %v377_v54  ;;  %390 = vpow2.f32 %v194_v49 }
  0x42   :  { %v381_v56 = vpop.eup %380  ;;  %255 = vst [vmem:[%s791_s1 + $0x1b8] sm:$0xff] %v379_v55  ;;  %392 = vpow2.f32 %v196_v51 }
  0x43   :  { %v383_v57 = vpop.eup %382  ;;  %256 = vst [vmem:[%s791_s1 + $0x1c0] sm:$0xff] %v381_v56  ;;  %394 = vpow2.f32 %v198_v53 }
  0x44   :  { %v385_v58 = vpop.eup %384  ;;  %257 = vst [vmem:[%s791_s1 + $0x1c8] sm:$0xff] %v383_v57 }
  0x45   :  { %v387_v59 = vpop.eup %386  ;;  %258 = vst [vmem:[%s791_s1 + $0x1d0] sm:$0xff] %v385_v58 }
  0x46   :  { %v389_v60 = vpop.eup %388  ;;  %259 = vst [vmem:[%s791_s1 + $0x1d8] sm:$0xff] %v387_v59 }
  0x47   :  { %v391_v61 = vpop.eup %390  ;;  %260 = vst [vmem:[%s791_s1 + $0x1e0] sm:$0xff] %v389_v60 }
  0x48   :  { %v393_v62 = vpop.eup %392  ;;  %261 = vst [vmem:[%s791_s1 + $0x1e8] sm:$0xff] %v391_v61 }
  0x49   :  { %v395_v63 = vpop.eup %394  ;;  %262 = vst [vmem:[%s791_s1 + $0x1f0] sm:$0xff] %v393_v62 }
  0x4a   :  { %263 = vst [vmem:[%s791_s1 + $0x1f8] sm:$0xff] %v395_v63 }

</bundles_post_ra>
